<compile_context>
chip_gen: v6e
topology: v6e:2x2x1
jax: 0.10.0
libtpu: 0.0.40
codegen_flags: <defaults>
</compile_context>

<pallas_src>
import math

import jax
import jax.numpy as jnp
from jax.experimental import pallas as pl
from jax.experimental.pallas import tpu as pltpu


# Portable scoped-VMEM budget: generous on v5e/v6e (128 MiB physical) and still leaves
# headroom on v7x (64 MiB physical).
_VMEM_LIMIT_BYTES = 48 * 1024 * 1024


# ----------------------------------------------------------------------------
# Tiling helpers
# ----------------------------------------------------------------------------
def _round_up(x, m):
    return ((x + m - 1) // m) * m


def _pick_tile(dim, cap, align):
    """Tile <= cap. Full dim if it already fits (always a legal block); else the
    largest aligned divisor; else the largest aligned tile <= cap — the caller then
    zero-pads the dimension to a multiple of the tile (never a full-dim fallback)."""
    if dim <= cap:
        return dim
    t = (cap // align) * align
    for cand in range(t, align - 1, -align):
        if dim % cand == 0:
            return cand
    return t


def _largest_divisor(dim, cap):
    """Largest divisor of dim that is <= cap (for axes that must not be padded)."""
    if dim <= cap:
        return dim
    for cand in range(cap, 0, -1):
        if dim % cand == 0:
            return cand
    return 1


# ----------------------------------------------------------------------------
# Tiled linear:  y = x @ w.T + b   (bf16 MXU operands, f32 accumulation)
# ----------------------------------------------------------------------------
def _linear_kernel(x_ref, w_ref, b_ref, o_ref, acc_ref):
    # x:(tm,tk) bf16, w:(tn,tk) bf16, b:(1,tn) f32 -> o:(tm,tn)
    k = pl.program_id(2)

    @pl.when(k == 0)
    def _init():
        acc_ref[...] = jnp.zeros_like(acc_ref)

    acc_ref[...] += jax.lax.dot_general(
        x_ref[...], w_ref[...],
        dimension_numbers=(((1,), (1,)), ((), ())),   # contract K on both; no transpose
        preferred_element_type=jnp.float32)

    @pl.when(k == pl.num_programs(2) - 1)
    def _finalize():
        o_ref[...] = (acc_ref[...] + b_ref[...]).astype(o_ref.dtype)


def pallas_linear(x, w, b, out_dtype=jnp.float32,
                  tm_cap=1024, tn_cap=1024, tk_cap=512):
    """x:(M,K), w:(N_out,K), b:(N_out,) -> (M,N_out). Tiled + pipelined + padded."""
    M, K = x.shape
    N_out = w.shape[0]
    tm = _pick_tile(M, tm_cap, 16)        # bf16 sublane packing
    tn = _pick_tile(N_out, tn_cap, 128)   # lane dim
    tk = _pick_tile(K, tk_cap, 128)       # lane dim
    Mp, Kp, Np = _round_up(M, tm), _round_up(K, tk), _round_up(N_out, tn)

    xb = x.astype(jnp.bfloat16)
    wb = w.astype(jnp.bfloat16)
    bf = b.astype(jnp.float32)
    if (Mp, Kp) != (M, K):
        xb = jnp.pad(xb, ((0, Mp - M), (0, Kp - K)))
    if (Np, Kp) != (N_out, K):
        wb = jnp.pad(wb, ((0, Np - N_out), (0, Kp - K)))
    if Np != N_out:
        bf = jnp.pad(bf, (0, Np - N_out))
    b2d = bf.reshape(1, Np)

    out_isz = jnp.dtype(out_dtype).itemsize
    cost = pl.CostEstimate(
        flops=2 * Mp * Np * Kp,
        transcendentals=0,
        bytes_accessed=2 * Mp * Kp * (Np // tn) + 2 * Np * Kp * (Mp // tm)
                       + out_isz * Mp * Np)

    out = pl.pallas_call(
        _linear_kernel,
        out_shape=jax.ShapeDtypeStruct((Mp, Np), out_dtype),
        grid=(Mp // tm, Np // tn, Kp // tk),            # reduction axis last
        in_specs=[
            pl.BlockSpec((tm, tk), lambda i, j, k: (i, k)),
            pl.BlockSpec((tn, tk), lambda i, j, k: (j, k)),
            pl.BlockSpec((1, tn), lambda i, j, k: (0, j)),
        ],
        out_specs=pl.BlockSpec((tm, tn), lambda i, j, k: (i, j)),
        scratch_shapes=[pltpu.VMEM((tm, tn), jnp.float32)],
        compiler_params=pltpu.CompilerParams(
            dimension_semantics=("parallel", "parallel", "arbitrary"),
            vmem_limit_bytes=_VMEM_LIMIT_BYTES),
        cost_estimate=cost,
    )(xb, wb, b2d)

    if (Mp, Np) != (M, N_out):
        out = out[:M, :N_out]
    return out


# ----------------------------------------------------------------------------
# Flash-style multi-head attention with a batch*heads grid axis
# ----------------------------------------------------------------------------
def _mha_kernel(q_ref, k_ref, v_ref, o_ref, m_sc, l_sc, acc_sc):
    # q:(tq,bh_t,hd) bf16 (softmax scale folded in), k/v:(ts,bh_t,hd) bf16
    # -> o:(tq,bh_t,hd) bf16. Online-softmax state in f32 VMEM scratch.
    j = pl.program_id(2)

    @pl.when(j == 0)
    def _init():
        m_sc[...] = jnp.full(m_sc.shape, -jnp.inf, jnp.float32)
        l_sc[...] = jnp.zeros(l_sc.shape, jnp.float32)
        acc_sc[...] = jnp.zeros(acc_sc.shape, jnp.float32)

    q = q_ref[...]
    k = k_ref[...]
    v = v_ref[...]

    # Per-(batch*head) scores; dot_general-natural batch-leading output order.
    s = jnp.einsum("qbd,kbd->bqk", q, k,
                   preferred_element_type=jnp.float32)       # (bh_t, tq, ts) f32

    m_prev = m_sc[...]                                       # (bh_t, tq)
    m_new = jnp.maximum(m_prev, jnp.max(s, axis=-1))         # (bh_t, tq)
    alpha = jnp.exp(m_prev - m_new)                          # (bh_t, tq)
    # TODO(synk): exp2 with log2(e) folded into the q scale + bf16 EUP exp (v6e/v7x)
    # to relieve the single EUP slot; kept f32 natural exp for accuracy here.
    p = jnp.exp(s - m_new[..., None])                        # (bh_t, tq, ts) f32
    l_sc[...] = alpha * l_sc[...] + jnp.sum(p, axis=-1)
    acc_sc[...] = alpha[..., None] * acc_sc[...] + jnp.einsum(
        "bqk,kbd->bqd", p.astype(v.dtype), v,
        preferred_element_type=jnp.float32)                  # (bh_t, tq, hd)
    m_sc[...] = m_new

    @pl.when(j == pl.num_programs(2) - 1)
    def _finalize():
        inv_l = pl.reciprocal(l_sc[...], approx=True)        # (bh_t, tq), EUP slot
        out = acc_sc[...] * inv_l[..., None]                 # (bh_t, tq, hd) f32
        # Single (b <-> q) swap per q tile (amortized over all KV steps) so the HBM
        # output is already lane-dense (L, BH, hd) == (L, N, E): no XLA transpose.
        o_ref[...] = pltpu.einshape("bqd->qbd", out).astype(o_ref.dtype)


def pallas_mha(q, k, v, tq_cap=256, ts_cap=512, bh_cap=16):
    """q:(L,BH,hd), k/v:(S,BH,hd) bf16 -> (L,BH,hd) bf16 attention output
    (row-major identical to (L, N, E))."""
    L, BH, hd = q.shape
    S = k.shape[0]
    tq = _pick_tile(L, tq_cap, 16)
    bh_t = _pick_tile(BH, bh_cap, 16)     # block's 2nd-minor dim: bf16 sublane packing
    # KV axis must never be zero-padded (it would corrupt the softmax): true divisor.
    ts = _largest_divisor(S, ts_cap)
    # TODO(synk): masked ragged KV tail instead of the divisor fallback for awkward S.

    Lp, BHp = _round_up(L, tq), _round_up(BH, bh_t)
    if Lp != L:
        q = jnp.pad(q, ((0, Lp - L), (0, 0), (0, 0)))
    if BHp != BH:
        q = jnp.pad(q, ((0, 0), (0, BHp - BH), (0, 0)))
        k = jnp.pad(k, ((0, 0), (0, BHp - BH), (0, 0)))
        v = jnp.pad(v, ((0, 0), (0, BHp - BH), (0, 0)))

    n_q = Lp // tq
    cost = pl.CostEstimate(
        flops=4 * BHp * Lp * S * hd,                 # QK^T + PV
        transcendentals=BHp * Lp * S,                # exp
        bytes_accessed=2 * (Lp * BHp * hd            # q read
                            + 2 * S * BHp * hd * n_q # k+v re-read per q tile
                            + Lp * BHp * hd))        # output write

    out = pl.pallas_call(
        _mha_kernel,
        out_shape=jax.ShapeDtypeStruct((Lp, BHp, hd), jnp.bfloat16),
        grid=(BHp // bh_t, n_q, S // ts),            # KV axis last ("arbitrary")
        in_specs=[
            pl.BlockSpec((tq, bh_t, hd), lambda b, i, j: (i, b, 0)),
            pl.BlockSpec((ts, bh_t, hd), lambda b, i, j: (j, b, 0)),
            pl.BlockSpec((ts, bh_t, hd), lambda b, i, j: (j, b, 0)),
        ],
        out_specs=pl.BlockSpec((tq, bh_t, hd), lambda b, i, j: (i, b, 0)),
        scratch_shapes=[
            pltpu.VMEM((bh_t, tq), jnp.float32),     # running max m (2-D: no lane-pad waste)
            pltpu.VMEM((bh_t, tq), jnp.float32),     # running denom l
            pltpu.VMEM((bh_t, tq, hd), jnp.float32), # accumulator
        ],
        compiler_params=pltpu.CompilerParams(
            dimension_semantics=("parallel", "parallel", "arbitrary"),
            vmem_limit_bytes=_VMEM_LIMIT_BYTES),
        cost_estimate=cost,
    )(q.astype(jnp.bfloat16), k.astype(jnp.bfloat16), v.astype(jnp.bfloat16))

    if (Lp, BHp) != (L, BH):
        out = out[:L, :BH]
    return out


# ----------------------------------------------------------------------------
# TransformerLayer forward
# ----------------------------------------------------------------------------
def transformer_layer_forward(X, K, V, params, num_heads):
    L, N, E = X.shape
    S = K.shape[0]
    hd = E // num_heads
    BH = N * num_heads
    scale = 1.0 / math.sqrt(hd)
    bf16 = jnp.bfloat16

    # Fold the 1/sqrt(head_dim) softmax scale into the query projection.
    w_q = params["w_q"] * scale
    b_q = params["b_q"] * scale

    if (X is K) and (K is V):
        # Self-attention: fused QKV projection reads X from HBM once.
        w_qkv = jnp.concatenate([w_q, params["w_k"], params["w_v"]], axis=0)
        b_qkv = jnp.concatenate([b_q, params["b_k"], params["b_v"]], axis=0)
        qkv = pallas_linear(X.reshape(L * N, E), w_qkv, b_qkv, out_dtype=bf16)
        q2d, k2d, v2d = qkv[:, :E], qkv[:, E:2 * E], qkv[:, 2 * E:]
    else:
        # Q/K/V projections (tiled bf16 MXU matmuls; bf16 intermediates to HBM).
        q2d = pallas_linear(X.reshape(L * N, E), w_q, b_q, out_dtype=bf16)
        k2d = pallas_linear(K.reshape(S * N, E), params["w_k"], params["b_k"], out_dtype=bf16)
        v2d = pallas_linear(V.reshape(S * N, E), params["w_v"], params["b_v"], out_dtype=bf16)

    # Head split is a free row-major reshape: (L*N, E) == (L, N*H, hd). No XLA transpose.
    q = q2d.reshape(L, BH, hd)
    k = k2d.reshape(S, BH, hd)
    v = v2d.reshape(S, BH, hd)

    # Attention output arrives already in (L, BH, hd) == (L, N, E) order (the head-merge
    # swap happens once inside the MHA finalize), so this reshape is free too.
    attn = pallas_mha(q, k, v)
    attn2d = attn.reshape(L * N, E)

    # Final output kept in f32 for fidelity with the PyTorch module output.
    out = pallas_linear(attn2d, params["w_o"], params["b_o"], out_dtype=jnp.float32)

    # nn.Dropout and MHA attention dropout: identity in eval mode.
    return out.reshape(L, N, E)


# ----------------------------------------------------------------------------
# Pure-JAX reference (f32) for a numerical sanity check
# ----------------------------------------------------------------------------
def reference_forward(X, K, V, params, num_heads):
    L, N, E = X.shape
    S = K.shape[0]
    hd = E // num_heads
    scale = 1.0 / math.sqrt(hd)
    q = X @ params["w_q"].T + params["b_q"]
    k = K @ params["w_k"].T + params["b_k"]
    v = V @ params["w_v"].T + params["b_v"]
    q = q.reshape(L, N * num_heads, hd).transpose(1, 0, 2) * scale
    k = k.reshape(S, N * num_heads, hd).transpose(1, 0, 2)
    v = v.reshape(S, N * num_heads, hd).transpose(1, 0, 2)
    s = jnp.einsum("bld,bsd->bls", q, k)
    a = jax.nn.softmax(s, axis=-1)
    o = jnp.einsum("bls,bsd->bld", a, v)
    o = o.transpose(1, 0, 2).reshape(L * N, E)
    return (o @ params["w_o"].T + params["b_o"]).reshape(L, N, E)


# ----------------------------------------------------------------------------
# Deterministic parameter init (shapes from nn.MultiheadAttention(hidden, heads))
# ----------------------------------------------------------------------------
def init_params(key, hidden_dim):
    ks = jax.random.split(key, 8)
    lim = 1.0 / math.sqrt(hidden_dim)

    def u(k, shape):
        return jax.random.uniform(k, shape, jnp.float32, -lim, lim)

    return {
        "w_q": u(ks[0], (hidden_dim, hidden_dim)),
        "w_k": u(ks[1], (hidden_dim, hidden_dim)),
        "w_v": u(ks[2], (hidden_dim, hidden_dim)),
        "b_q": u(ks[3], (hidden_dim,)),
        "b_k": u(ks[4], (hidden_dim,)),
        "b_v": u(ks[5], (hidden_dim,)),
        "w_o": u(ks[6], (hidden_dim, hidden_dim)),
        "b_o": jnp.zeros((hidden_dim,), jnp.float32),
    }


if __name__ == "__main__":
    hidden_dim = 32
    num_heads = 4
    seq_len = 8      # tgt_len (X) and src_len (K, V)
    batch = 2

    key = jax.random.PRNGKey(0)
    k_x, k_k, k_v, k_p = jax.random.split(key, 4)

    # (seq, batch, hidden) — PyTorch MHA default layout (batch_first=False)
    X = jax.random.normal(k_x, (seq_len, batch, hidden_dim), jnp.float32)
    K = jax.random.normal(k_k, (seq_len, batch, hidden_dim), jnp.float32)
    V = jax.random.normal(k_v, (seq_len, batch, hidden_dim), jnp.float32)

    params = init_params(k_p, hidden_dim)

    fwd = jax.jit(transformer_layer_forward, static_argnames=("num_heads",))
    out = fwd(X, K, V, params, num_heads=num_heads)
    out = jax.block_until_ready(out)

    assert out.shape == (seq_len, batch, hidden_dim)
    assert bool(jnp.all(jnp.isfinite(out)))

    ref = reference_forward(X, K, V, params, num_heads)
    max_err = float(jnp.max(jnp.abs(out - ref)))
    assert max_err < 1e-1, f"mismatch vs reference: max abs err {max_err}"

    print("KERNEL_OK")
</pallas_src>

<mosaic_0001>
module attributes {stable_mosaic.version = 11 : i64} {
  func.func @_linear_kernel(%arg0: i32, %arg1: i32, %arg2: i32, %arg3: memref<16x32xbf16, #tpu.memory_space<vmem>>, %arg4: memref<32x32xbf16, #tpu.memory_space<vmem>>, %arg5: memref<1x32xf32, #tpu.memory_space<vmem>>, %arg6: memref<16x32xbf16, #tpu.memory_space<vmem>>, %arg7: memref<16x32xf32, #tpu.memory_space<vmem>>) attributes {dimension_semantics = [#tpu.dimension_semantics<parallel>, #tpu.dimension_semantics<parallel>, #tpu.dimension_semantics<arbitrary>], iteration_bounds = array<i64: 1, 1, 1>, scalar_prefetch = 0 : i64, scratch_operands = 1 : i64, tpu.core_type = #tpu.core_type<tc>, window_params = [{transform_indices = @transform_0, window_bounds = array<i64: 16, 32>}, {transform_indices = @transform_1, window_bounds = array<i64: 32, 32>}, {transform_indices = @transform_2, window_bounds = array<i64: 1, 32>}, {transform_indices = @transform_3, window_bounds = array<i64: 16, 32>}]} {
    %c0_i32 = arith.constant 0 : i32
    %0 = arith.cmpi eq, %arg2, %c0_i32 : i32
    %1 = arith.extui %0 : i1 to i32
    %c0_i32_0 = arith.constant 0 : i32
    %2 = arith.cmpi ne, %1, %c0_i32_0 : i32
    scf.if %2 {
      %cst_10 = arith.constant 0.000000e+00 : f32
      %12 = vector.broadcast %cst_10 : f32 to vector<16x32xf32>
      %c0_11 = arith.constant 0 : index
      %c0_12 = arith.constant 0 : index
      %13 = vector.load %arg7[%c0_11, %c0_12] : memref<16x32xf32, #tpu.memory_space<vmem>>, vector<16x32xf32>
      tpu.vector_store %arg7[%c0_11, %c0_12], %12 {strides = array<i32>} : memref<16x32xf32, #tpu.memory_space<vmem>>, vector<16x32xf32>,
    } else {
    }
    %c0 = arith.constant 0 : index
    %c0_1 = arith.constant 0 : index
    %3 = vector.load %arg7[%c0, %c0_1] : memref<16x32xf32, #tpu.memory_space<vmem>>, vector<16x32xf32>
    %c0_2 = arith.constant 0 : index
    %c0_3 = arith.constant 0 : index
    %4 = vector.load %arg3[%c0_2, %c0_3] : memref<16x32xbf16, #tpu.memory_space<vmem>>, vector<16x32xbf16>
    %c0_4 = arith.constant 0 : index
    %c0_5 = arith.constant 0 : index
    %5 = vector.load %arg4[%c0_4, %c0_5] : memref<32x32xbf16, #tpu.memory_space<vmem>>, vector<32x32xbf16>
    %cst = arith.constant dense<0.000000e+00> : vector<16x32xf32>
    %6 = tpu.matmul %4, %5, %cst {dimension_numbers = #tpu.dot_dimension_numbers<[1], [1], [0], [0], [0, 0, 1, 0], [], []>} : vector<16x32xbf16>, vector<32x32xbf16>, vector<16x32xf32> -> vector<16x32xf32>
    %7 = arith.addf %3, %6 : vector<16x32xf32>
    %c0_6 = arith.constant 0 : index
    %c0_7 = arith.constant 0 : index
    %8 = vector.load %arg7[%c0_6, %c0_7] : memref<16x32xf32, #tpu.memory_space<vmem>>, vector<16x32xf32>
    tpu.vector_store %arg7[%c0_6, %c0_7], %7 {strides = array<i32>} : memref<16x32xf32, #tpu.memory_space<vmem>>, vector<16x32xf32>,
    %c0_i32_8 = arith.constant 0 : i32
    %9 = arith.cmpi eq, %arg2, %c0_i32_8 : i32
    %10 = arith.extui %9 : i1 to i32
    %c0_i32_9 = arith.constant 0 : i32
    %11 = arith.cmpi ne, %10, %c0_i32_9 : i32
    scf.if %11 {
      %c0_10 = arith.constant 0 : index
      %c0_11 = arith.constant 0 : index
      %12 = vector.load %arg7[%c0_10, %c0_11] : memref<16x32xf32, #tpu.memory_space<vmem>>, vector<16x32xf32>
      %c0_12 = arith.constant 0 : index
      %c0_13 = arith.constant 0 : index
      %13 = vector.load %arg5[%c0_12, %c0_13] : memref<1x32xf32, #tpu.memory_space<vmem>>, vector<1x32xf32>
      %14 = vector.broadcast %13 : vector<1x32xf32> to vector<16x32xf32>
      %15 = arith.addf %12, %14 : vector<16x32xf32>
      %16 = arith.truncf %15 : vector<16x32xf32> to vector<16x32xbf16>
      %c0_14 = arith.constant 0 : index
      %c0_15 = arith.constant 0 : index
      %17 = vector.load %arg6[%c0_14, %c0_15] : memref<16x32xbf16, #tpu.memory_space<vmem>>, vector<16x32xbf16>
      tpu.vector_store %arg6[%c0_14, %c0_15], %16 {strides = array<i32>} : memref<16x32xbf16, #tpu.memory_space<vmem>>, vector<16x32xbf16>,
    } else {
    }
    return
  }
  func.func @transform_0(%arg0: i32, %arg1: i32, %arg2: i32) -> (i32, i32) {
    %c0_i32 = arith.constant 0 : i32
    return %arg0, %arg2 : i32, i32
  }
  func.func @transform_1(%arg0: i32, %arg1: i32, %arg2: i32) -> (i32, i32) {
    %c0_i32 = arith.constant 0 : i32
    return %arg1, %arg2 : i32, i32
  }
  func.func @transform_2(%arg0: i32, %arg1: i32, %arg2: i32) -> (i32, i32) {
    %c0_i32 = arith.constant 0 : i32
    %c0_i32_0 = arith.constant 0 : i32
    return %c0_i32, %arg1 : i32, i32
  }
  func.func @transform_3(%arg0: i32, %arg1: i32, %arg2: i32) -> (i32, i32) {
    %c0_i32 = arith.constant 0 : i32
    return %arg0, %arg1 : i32, i32
  }
}

module attributes {stable_mosaic.version = 11 : i64} {
  func.func @_mha_kernel(%arg0: i32, %arg1: i32, %arg2: i32, %arg3: memref<8x8x8xbf16, #tpu.memory_space<vmem>>, %arg4: memref<8x8x8xbf16, #tpu.memory_space<vmem>>, %arg5: memref<8x8x8xbf16, #tpu.memory_space<vmem>>, %arg6: memref<8x8x8xbf16, #tpu.memory_space<vmem>>, %arg7: memref<8x8xf32, #tpu.memory_space<vmem>>, %arg8: memref<8x8xf32, #tpu.memory_space<vmem>>, %arg9: memref<8x8x8xf32, #tpu.memory_space<vmem>>) attributes {dimension_semantics = [#tpu.dimension_semantics<parallel>, #tpu.dimension_semantics<parallel>, #tpu.dimension_semantics<arbitrary>], iteration_bounds = array<i64: 1, 1, 1>, scalar_prefetch = 0 : i64, scratch_operands = 3 : i64, tpu.core_type = #tpu.core_type<tc>, window_params = [{transform_indices = @transform_0, window_bounds = array<i64: 8, 8, 8>}, {transform_indices = @transform_1, window_bounds = array<i64: 8, 8, 8>}, {transform_indices = @transform_2, window_bounds = array<i64: 8, 8, 8>}, {transform_indices = @transform_3, window_bounds = array<i64: 8, 8, 8>}]} {
    %c0_i32 = arith.constant 0 : i32
    %0 = arith.cmpi eq, %arg2, %c0_i32 : i32
    %1 = arith.extui %0 : i1 to i32
    %c0_i32_0 = arith.constant 0 : i32
    %2 = arith.cmpi ne, %1, %c0_i32_0 : i32
    scf.if %2 {
      %cst_28 = arith.constant 0xFF800000 : f32
      %33 = vector.broadcast %cst_28 : f32 to vector<8x8xf32>
      %c0_29 = arith.constant 0 : index
      %c0_30 = arith.constant 0 : index
      %34 = vector.load %arg7[%c0_29, %c0_30] : memref<8x8xf32, #tpu.memory_space<vmem>>, vector<8x8xf32>
      tpu.vector_store %arg7[%c0_29, %c0_30], %33 {strides = array<i32>} : memref<8x8xf32, #tpu.memory_space<vmem>>, vector<8x8xf32>,
      %cst_31 = arith.constant 0.000000e+00 : f32
      %35 = vector.broadcast %cst_31 : f32 to vector<8x8xf32>
      %c0_32 = arith.constant 0 : index
      %c0_33 = arith.constant 0 : index
      %36 = vector.load %arg8[%c0_32, %c0_33] : memref<8x8xf32, #tpu.memory_space<vmem>>, vector<8x8xf32>
      tpu.vector_store %arg8[%c0_32, %c0_33], %35 {strides = array<i32>} : memref<8x8xf32, #tpu.memory_space<vmem>>, vector<8x8xf32>,
      %cst_34 = arith.constant 0.000000e+00 : f32
      %37 = vector.broadcast %cst_34 : f32 to vector<8x8x8xf32>
      %c0_35 = arith.constant 0 : index
      %c0_36 = arith.constant 0 : index
      %c0_37 = arith.constant 0 : index
      %38 = vector.load %arg9[%c0_35, %c0_36, %c0_37] : memref<8x8x8xf32, #tpu.memory_space<vmem>>, vector<8x8x8xf32>
      tpu.vector_store %arg9[%c0_35, %c0_36, %c0_37], %37 {strides = array<i32>} : memref<8x8x8xf32, #tpu.memory_space<vmem>>, vector<8x8x8xf32>,
    } else {
    }
    %c0 = arith.constant 0 : index
    %c0_1 = arith.constant 0 : index
    %c0_2 = arith.constant 0 : index
    %3 = vector.load %arg3[%c0, %c0_1, %c0_2] : memref<8x8x8xbf16, #tpu.memory_space<vmem>>, vector<8x8x8xbf16>
    %c0_3 = arith.constant 0 : index
    %c0_4 = arith.constant 0 : index
    %c0_5 = arith.constant 0 : index
    %4 = vector.load %arg4[%c0_3, %c0_4, %c0_5] : memref<8x8x8xbf16, #tpu.memory_space<vmem>>, vector<8x8x8xbf16>
    %c0_6 = arith.constant 0 : index
    %c0_7 = arith.constant 0 : index
    %c0_8 = arith.constant 0 : index
    %5 = vector.load %arg5[%c0_6, %c0_7, %c0_8] : memref<8x8x8xbf16, #tpu.memory_space<vmem>>, vector<8x8x8xbf16>
    "tpu.trace_start"() <{level = 10 : i32, message = "qbd,kbd->bqk"}> : () -> ()
    %cst = arith.constant dense<0.000000e+00> : vector<8x8x8xf32>
    %6 = tpu.matmul %3, %4, %cst {dimension_numbers = #tpu.dot_dimension_numbers<[2], [2], [0], [0], [0, 1, 0, 0, 1, 0], [1], [1]>} : vector<8x8x8xbf16>, vector<8x8x8xbf16>, vector<8x8x8xf32> -> vector<8x8x8xf32>
    "tpu.trace_stop"() : () -> ()
    %c0_9 = arith.constant 0 : index
    %c0_10 = arith.constant 0 : index
    %7 = vector.load %arg7[%c0_9, %c0_10] : memref<8x8xf32, #tpu.memory_space<vmem>>, vector<8x8xf32>
    %cst_11 = arith.constant dense<0xFF800000> : vector<8x8xf32>
    %8 = vector.multi_reduction <maximumf>, %6, %cst_11 [2] : vector<8x8x8xf32> to vector<8x8xf32>
    %9 = arith.maximumf %7, %8 : vector<8x8xf32>
    %10 = arith.subf %7, %9 : vector<8x8xf32>
    %11 = math.exp %10 : vector<8x8xf32>
    %12 = vector.shape_cast %9 : vector<8x8xf32> to vector<8x8x1xf32>
    %13 = vector.broadcast %12 : vector<8x8x1xf32> to vector<8x8x8xf32>
    %14 = arith.subf %6, %13 : vector<8x8x8xf32>
    %15 = math.exp %14 : vector<8x8x8xf32>
    %c0_12 = arith.constant 0 : index
    %c0_13 = arith.constant 0 : index
    %16 = vector.load %arg8[%c0_12, %c0_13] : memref<8x8xf32, #tpu.memory_space<vmem>>, vector<8x8xf32>
    %17 = arith.mulf %11, %16 : vector<8x8xf32>
    %cst_14 = arith.constant dense<0.000000e+00> : vector<8x8xf32>
    %18 = vector.multi_reduction <add>, %15, %cst_14 [2] : vector<8x8x8xf32> to vector<8x8xf32>
    %19 = arith.addf %17, %18 : vector<8x8xf32>
    %c0_15 = arith.constant 0 : index
    %c0_16 = arith.constant 0 : index
    %20 = vector.load %arg8[%c0_15, %c0_16] : memref<8x8xf32, #tpu.memory_space<vmem>>, vector<8x8xf32>
    tpu.vector_store %arg8[%c0_15, %c0_16], %19 {strides = array<i32>} : memref<8x8xf32, #tpu.memory_space<vmem>>, vector<8x8xf32>,
    %21 = vector.shape_cast %11 : vector<8x8xf32> to vector<8x8x1xf32>
    %c0_17 = arith.constant 0 : index
    %c0_18 = arith.constant 0 : index
    %c0_19 = arith.constant 0 : index
    %22 = vector.load %arg9[%c0_17, %c0_18, %c0_19] : memref<8x8x8xf32, #tpu.memory_space<vmem>>, vector<8x8x8xf32>
    %23 = vector.broadcast %21 : vector<8x8x1xf32> to vector<8x8x8xf32>
    %24 = arith.mulf %23, %22 : vector<8x8x8xf32>
    %25 = arith.truncf %15 : vector<8x8x8xf32> to vector<8x8x8xbf16>
    "tpu.trace_start"() <{level = 10 : i32, message = "bqk,kbd->bqd"}> : () -> ()
    %cst_20 = arith.constant dense<0.000000e+00> : vector<8x8x8xf32>
    %26 = tpu.matmul %25, %5, %cst_20 {dimension_numbers = #tpu.dot_dimension_numbers<[2], [0], [1], [2], [0, 0, 0, 1, 1, 2], [0], [1]>} : vector<8x8x8xbf16>, vector<8x8x8xbf16>, vector<8x8x8xf32> -> vector<8x8x8xf32>
    "tpu.trace_stop"() : () -> ()
    %27 = arith.addf %24, %26 : vector<8x8x8xf32>
    %c0_21 = arith.constant 0 : index
    %c0_22 = arith.constant 0 : index
    %c0_23 = arith.constant 0 : index
    %28 = vector.load %arg9[%c0_21, %c0_22, %c0_23] : memref<8x8x8xf32, #tpu.memory_space<vmem>>, vector<8x8x8xf32>
    tpu.vector_store %arg9[%c0_21, %c0_22, %c0_23], %27 {strides = array<i32>} : memref<8x8x8xf32, #tpu.memory_space<vmem>>, vector<8x8x8xf32>,
    %c0_24 = arith.constant 0 : index
    %c0_25 = arith.constant 0 : index
    %29 = vector.load %arg7[%c0_24, %c0_25] : memref<8x8xf32, #tpu.memory_space<vmem>>, vector<8x8xf32>
    tpu.vector_store %arg7[%c0_24, %c0_25], %9 {strides = array<i32>} : memref<8x8xf32, #tpu.memory_space<vmem>>, vector<8x8xf32>,
    %c0_i32_26 = arith.constant 0 : i32
    %30 = arith.cmpi eq, %arg2, %c0_i32_26 : i32
    %31 = arith.extui %30 : i1 to i32
    %c0_i32_27 = arith.constant 0 : i32
    %32 = arith.cmpi ne, %31, %c0_i32_27 : i32
    scf.if %32 {
      %c0_28 = arith.constant 0 : index
      %c0_29 = arith.constant 0 : index
      %33 = vector.load %arg8[%c0_28, %c0_29] : memref<8x8xf32, #tpu.memory_space<vmem>>, vector<8x8xf32>
      %34 = tpu.reciprocal %33 {approx = true} : vector<8x8xf32> -> vector<8x8xf32>
      %c0_30 = arith.constant 0 : index
      %c0_31 = arith.constant 0 : index
      %c0_32 = arith.constant 0 : index
      %35 = vector.load %arg9[%c0_30, %c0_31, %c0_32] : memref<8x8x8xf32, #tpu.memory_space<vmem>>, vector<8x8x8xf32>
      %36 = vector.shape_cast %34 : vector<8x8xf32> to vector<8x8x1xf32>
      %37 = vector.broadcast %36 : vector<8x8x1xf32> to vector<8x8x8xf32>
      %38 = arith.mulf %35, %37 : vector<8x8x8xf32>
      %39 = tpu.transpose %38, [1, 0, 2] : vector<8x8x8xf32> -> vector<8x8x8xf32>
      %40 = arith.truncf %39 : vector<8x8x8xf32> to vector<8x8x8xbf16>
      %c0_33 = arith.constant 0 : index
      %c0_34 = arith.constant 0 : index
      %c0_35 = arith.constant 0 : index
      %41 = vector.load %arg6[%c0_33, %c0_34, %c0_35] : memref<8x8x8xbf16, #tpu.memory_space<vmem>>, vector<8x8x8xbf16>
      tpu.vector_store %arg6[%c0_33, %c0_34, %c0_35], %40 {strides = array<i32>} : memref<8x8x8xbf16, #tpu.memory_space<vmem>>, vector<8x8x8xbf16>,
    } else {
    }
    return
  }
  func.func @transform_0(%arg0: i32, %arg1: i32, %arg2: i32) -> (i32, i32, i32) {
    %c0_i32 = arith.constant 0 : i32
    %c0_i32_0 = arith.constant 0 : i32
    return %arg1, %arg0, %c0_i32 : i32, i32, i32
  }
  func.func @transform_1(%arg0: i32, %arg1: i32, %arg2: i32) -> (i32, i32, i32) {
    %c0_i32 = arith.constant 0 : i32
    %c0_i32_0 = arith.constant 0 : i32
    return %arg2, %arg0, %c0_i32 : i32, i32, i32
  }
  func.func @transform_2(%arg0: i32, %arg1: i32, %arg2: i32) -> (i32, i32, i32) {
    %c0_i32 = arith.constant 0 : i32
    %c0_i32_0 = arith.constant 0 : i32
    return %arg2, %arg0, %c0_i32 : i32, i32, i32
  }
  func.func @transform_3(%arg0: i32, %arg1: i32, %arg2: i32) -> (i32, i32, i32) {
    %c0_i32 = arith.constant 0 : i32
    %c0_i32_0 = arith.constant 0 : i32
    return %arg1, %arg0, %c0_i32 : i32, i32, i32
  }
}

module attributes {stable_mosaic.version = 11 : i64} {
  func.func @_linear_kernel(%arg0: i32, %arg1: i32, %arg2: i32, %arg3: memref<16x32xbf16, #tpu.memory_space<vmem>>, %arg4: memref<32x32xbf16, #tpu.memory_space<vmem>>, %arg5: memref<1x32xf32, #tpu.memory_space<vmem>>, %arg6: memref<16x32xf32, #tpu.memory_space<vmem>>, %arg7: memref<16x32xf32, #tpu.memory_space<vmem>>) attributes {dimension_semantics = [#tpu.dimension_semantics<parallel>, #tpu.dimension_semantics<parallel>, #tpu.dimension_semantics<arbitrary>], iteration_bounds = array<i64: 1, 1, 1>, scalar_prefetch = 0 : i64, scratch_operands = 1 : i64, tpu.core_type = #tpu.core_type<tc>, window_params = [{transform_indices = @transform_0, window_bounds = array<i64: 16, 32>}, {transform_indices = @transform_1, window_bounds = array<i64: 32, 32>}, {transform_indices = @transform_2, window_bounds = array<i64: 1, 32>}, {transform_indices = @transform_3, window_bounds = array<i64: 16, 32>}]} {
    %c0_i32 = arith.constant 0 : i32
    %0 = arith.cmpi eq, %arg2, %c0_i32 : i32
    %1 = arith.extui %0 : i1 to i32
    %c0_i32_0 = arith.constant 0 : i32
    %2 = arith.cmpi ne, %1, %c0_i32_0 : i32
    scf.if %2 {
      %cst_10 = arith.constant 0.000000e+00 : f32
      %12 = vector.broadcast %cst_10 : f32 to vector<16x32xf32>
      %c0_11 = arith.constant 0 : index
      %c0_12 = arith.constant 0 : index
      %13 = vector.load %arg7[%c0_11, %c0_12] : memref<16x32xf32, #tpu.memory_space<vmem>>, vector<16x32xf32>
      tpu.vector_store %arg7[%c0_11, %c0_12], %12 {strides = array<i32>} : memref<16x32xf32, #tpu.memory_space<vmem>>, vector<16x32xf32>,
    } else {
    }
    %c0 = arith.constant 0 : index
    %c0_1 = arith.constant 0 : index
    %3 = vector.load %arg7[%c0, %c0_1] : memref<16x32xf32, #tpu.memory_space<vmem>>, vector<16x32xf32>
    %c0_2 = arith.constant 0 : index
    %c0_3 = arith.constant 0 : index
    %4 = vector.load %arg3[%c0_2, %c0_3] : memref<16x32xbf16, #tpu.memory_space<vmem>>, vector<16x32xbf16>
    %c0_4 = arith.constant 0 : index
    %c0_5 = arith.constant 0 : index
    %5 = vector.load %arg4[%c0_4, %c0_5] : memref<32x32xbf16, #tpu.memory_space<vmem>>, vector<32x32xbf16>
    %cst = arith.constant dense<0.000000e+00> : vector<16x32xf32>
    %6 = tpu.matmul %4, %5, %cst {dimension_numbers = #tpu.dot_dimension_numbers<[1], [1], [0], [0], [0, 0, 1, 0], [], []>} : vector<16x32xbf16>, vector<32x32xbf16>, vector<16x32xf32> -> vector<16x32xf32>
    %7 = arith.addf %3, %6 : vector<16x32xf32>
    %c0_6 = arith.constant 0 : index
    %c0_7 = arith.constant 0 : index
    %8 = vector.load %arg7[%c0_6, %c0_7] : memref<16x32xf32, #tpu.memory_space<vmem>>, vector<16x32xf32>
    tpu.vector_store %arg7[%c0_6, %c0_7], %7 {strides = array<i32>} : memref<16x32xf32, #tpu.memory_space<vmem>>, vector<16x32xf32>,
    %c0_i32_8 = arith.constant 0 : i32
    %9 = arith.cmpi eq, %arg2, %c0_i32_8 : i32
    %10 = arith.extui %9 : i1 to i32
    %c0_i32_9 = arith.constant 0 : i32
    %11 = arith.cmpi ne, %10, %c0_i32_9 : i32
    scf.if %11 {
      %c0_10 = arith.constant 0 : index
      %c0_11 = arith.constant 0 : index
      %12 = vector.load %arg7[%c0_10, %c0_11] : memref<16x32xf32, #tpu.memory_space<vmem>>, vector<16x32xf32>
      %c0_12 = arith.constant 0 : index
      %c0_13 = arith.constant 0 : index
      %13 = vector.load %arg5[%c0_12, %c0_13] : memref<1x32xf32, #tpu.memory_space<vmem>>, vector<1x32xf32>
      %14 = vector.broadcast %13 : vector<1x32xf32> to vector<16x32xf32>
      %15 = arith.addf %12, %14 : vector<16x32xf32>
      %c0_14 = arith.constant 0 : index
      %c0_15 = arith.constant 0 : index
      %16 = vector.load %arg6[%c0_14, %c0_15] : memref<16x32xf32, #tpu.memory_space<vmem>>, vector<16x32xf32>
      tpu.vector_store %arg6[%c0_14, %c0_15], %15 {strides = array<i32>} : memref<16x32xf32, #tpu.memory_space<vmem>>, vector<16x32xf32>,
    } else {
    }
    return
  }
  func.func @transform_0(%arg0: i32, %arg1: i32, %arg2: i32) -> (i32, i32) {
    %c0_i32 = arith.constant 0 : i32
    return %arg0, %arg2 : i32, i32
  }
  func.func @transform_1(%arg0: i32, %arg1: i32, %arg2: i32) -> (i32, i32) {
    %c0_i32 = arith.constant 0 : i32
    return %arg1, %arg2 : i32, i32
  }
  func.func @transform_2(%arg0: i32, %arg1: i32, %arg2: i32) -> (i32, i32) {
    %c0_i32 = arith.constant 0 : i32
    %c0_i32_0 = arith.constant 0 : i32
    return %c0_i32, %arg1 : i32, i32
  }
  func.func @transform_3(%arg0: i32, %arg1: i32, %arg2: i32) -> (i32, i32) {
    %c0_i32 = arith.constant 0 : i32
    return %arg0, %arg1 : i32, i32
  }
}

</mosaic_0001>

<bundles_post_ra>
// kernel: transformer_layer_forward.5
= control target key start
LH: loop header
LB: loop body
LE: loop exit
PB: predicated region body
PF: predicated region fallthrough
CT: control target
= control target key end

     0   :  { %vm19_vm0 = vcmask 261120   ;;  %v154_v0 = vmov 0.0   ;;  %vm155_vm1 = vmmov 0   ;;  %vm122_vm2 = vcmask 257024   ;;  %s201_s1 = inlined_call_operand.vmem [shape: bf16[32,32], index: 1, kind: input, shape index: {}]   ;;  %s202_s0 = inlined_call_operand.vmem [shape: bf16[16,32], index: 0, kind: input, shape index: {}]   ;;  %s203_s2 = inlined_call_operand.vmem [shape: f32[1,32], index: 2, kind: input, shape index: {}]   ;;  %s204_s3 = inlined_call_operand.vmem [shape: bf16[16,32], index: 3, kind: output, shape index: {}]  }
   0x1   :  { %141 = vmatprep.subr.bf16.mxu0 %v154_v0  ;;  %v151_v1 = vld [vmem:[%s201_s1 + $0x8] sm:$0xff]   ;;  %20 = vst.msk [vmem:[#allocation2] sm:$0xff] %vm19_vm0, %v154_v0  ;;  %21 = vst.msk [vmem:[#allocation2 + $0x8] sm:$0xff] %vm19_vm0, %v154_v0  ;;  %145 = vmatprep.mubr.msk.bf16.mxu0 %vm155_vm1, %v154_v0  ;;  %v152_v3 = vld [vmem:[%s201_s1] sm:$0xff]  }
   0x2   :  { %v53_v2 = vsel %vm19_vm0, %v151_v1, 0  ;;  %v50_v4 = vsel %vm19_vm0, %v152_v3, 0  ;;  %v153_v5 = vld [vmem:[%s202_s0] sm:$0xff]  }
   0x3   :  { %142 = vmatpush3.bf16.xpose.msra.mxu0 %v53_v2  ;;  %v133_v14 = vld [vmem:[%s203_s2] ss:$0 sm:$0xff] }
   0x4   :  { %143 = vmatprep.subr.bf16.mxu0 %v154_v0 }
   0x8   :  { %v22_v6 = vld [vmem:[#allocation2] sm:$0xff]  ;;  %v23_v10 = vld [vmem:[#allocation2 + $0x8] sm:$0xff] }
   0xb   :  { %144 = vmatpush3.bf16.xpose.msra.mxu0 %v50_v4 }
  0x12   :  { %146 = vmatmul.mubr.msk.bf16.vlgmr.msra.gmra.mxu0 %vm19_vm0, %v153_v5 }
  0xd2   :  { %v89_v7 = vpop.f32.mrf.mxu0 }
  0xd3   :  { %v96_v8 = vadd.f32 %v89_v7, %v22_v6 }
  0xd4   :  { %v147_v9 = vpop.f32.mrf.mxu0 }
  0xd5   :  { %98 = vst.msk [vmem:[#allocation2] sm:$0xff] %vm19_vm0, %v96_v8 }
  0xd6   :  { %v92_v11 = vpop.f32.mrf.mxu0 }
  0xd7   :  { %v97_v12 = vadd.f32 %v92_v11, %v23_v10 }
  0xd8   :  { %v148_v13 = vpop.f32.mrf.mxu0 }
  0xd9   :  { %99 = vst.msk [vmem:[#allocation2 + $0x8] sm:$0xff] %vm19_vm0, %v97_v12 }
  0xdc   :  { %v103_v15 = vld [vmem:[#allocation2] sm:$0xff] }
  0xdd   :  { %v112_v16 = vadd.f32 %v133_v14, %v103_v15 }
  0xdf   :  { %v136_v17 = vpack.c.bf16 %v112_v16, %v112_v16 }
  0xe0   :  { %v104_v18 = vld [vmem:[#allocation2 + $0x8] sm:$0xff] }
  0xe1   :  { %123 = vst.msk [vmem:[%s204_s3] sm:$0xf] %vm122_vm2, %v136_v17  ;;  %v113_v19 = vadd.f32 %v133_v14, %v104_v18 }
  0xe3   :  { %v137_v20 = vpack.c.bf16 %v113_v19, %v113_v19 }
  0xe5   :  { %124 = vst.msk [vmem:[%s204_s3 + $0x4] sm:$0xf] %vm122_vm2, %v137_v20 }

// kernel: transformer_layer_forward.9
= control target key start
LH: loop header
LB: loop body
LE: loop exit
PB: predicated region body
PF: predicated region fallthrough
CT: control target
= control target key end

     0   :  { %vm20_vm0 = vcmask 261120   ;;  %v179_v0 = vmov 0.0   ;;  %vm180_vm1 = vmmov 0   ;;  %s228_s0 = inlined_call_operand.vmem [shape: bf16[16,32], index: 0, kind: input, shape index: {}]   ;;  %s229_s1 = inlined_call_operand.vmem [shape: bf16[32,32], index: 1, kind: input, shape index: {}]   ;;  %s230_s2 = inlined_call_operand.vmem [shape: f32[1,32], index: 2, kind: input, shape index: {}]   ;;  %s231_s3 = inlined_call_operand.hbm [shape: f32[16,32], index: 3, kind: output, shape index: {}]  }
   0x1   :  { %141 = vmatprep.subr.bf16.mxu0 %v179_v0  ;;  %v154_v1 = vld [vmem:[%s229_s1 + $0x8] sm:$0xff]   ;;  %21 = vst.msk [vmem:[#allocation2] sm:$0xff] %vm20_vm0, %v179_v0  ;;  %22 = vst.msk [vmem:[#allocation2 + $0x8] sm:$0xff] %vm20_vm0, %v179_v0  ;;  %145 = vmatprep.mubr.msk.bf16.mxu0 %vm180_vm1, %v179_v0 }
   0x2   :  { %v54_v2 = vsel %vm20_vm0, %v154_v1, 0 }
   0x3   :  { %8 = vsyncpa [#allocation4], 0  ;;  %142 = vmatpush3.bf16.xpose.msra.mxu0 %v54_v2  ;;  %v155_v3 = vld [vmem:[%s229_s1] sm:$0xff]  }
   0x4   :  { %143 = vmatprep.subr.bf16.mxu0 %v179_v0  ;;  %v51_v4 = vsel %vm20_vm0, %v155_v3, 0  ;;  %v156_v5 = vld [vmem:[%s228_s0] sm:$0xff]   ;;  %s181_s0 = smov [#allocation3]  }
   0x5   :  { %v137_v14 = vld [vmem:[%s230_s2] ss:$0 sm:$0xff]  ;;  %s122_s19 = sshll.u32 %s181_s0, 4  ;;  %s123_s19 = int_to_ptr.vmem [resolvable:$true] %s122_s19 }
   0x6   :  { %s157_s20 = scalar_lea.vmem %s123_s19, 256  ;;  %p162_p1 = scmp.lt.s32.totalorder %s123_s19, %s123_s19 }
   0x7   :  { %p158_p0 = scmp.ne.s32.totalorder %s123_s19, %s157_s20  ;;  %p163_p2 = scmp.lt.s32.totalorder %s157_s20, %s157_s20 }
   0x8   :  { %v23_v6 = vld [vmem:[#allocation2] sm:$0xff]  ;;  %v24_v10 = vld [vmem:[#allocation2 + $0x8] sm:$0xff] }
   0x9   :  { %p164_p3 = por %p163_p2, %p162_p1 }
   0xb   :  { %144 = vmatpush3.bf16.xpose.msra.mxu0 %v51_v4  ;;  %p165_p4 = pnand %p164_p3, %p158_p0 }
  0x12   :  { %146 = vmatmul.mubr.msk.bf16.vlgmr.msra.gmra.mxu0 %vm20_vm0, %v156_v5 }
  0xd2   :  { %v90_v7 = vpop.f32.mrf.mxu0 }
  0xd3   :  { %v97_v8 = vadd.f32 %v90_v7, %v23_v6 }
  0xd4   :  { %v147_v9 = vpop.f32.mrf.mxu0 }
  0xd5   :  { %99 = vst.msk [vmem:[#allocation2] sm:$0xff] %vm20_vm0, %v97_v8 }
  0xd6   :  { %v93_v11 = vpop.f32.mrf.mxu0 }
  0xd7   :  { %v98_v12 = vadd.f32 %v93_v11, %v24_v10 }
  0xd8   :  { %v148_v13 = vpop.f32.mrf.mxu0 }
  0xd9   :  { %100 = vst.msk [vmem:[#allocation2 + $0x8] sm:$0xff] %vm20_vm0, %v98_v12 }
  0xdc   :  { %v104_v15 = vld [vmem:[#allocation2] sm:$0xff] }
  0xdd   :  { %v113_v16 = vadd.f32 %v137_v14, %v104_v15 }
  0xdf   :  { %115 = vst.msk [vmem:[#allocation3] sm:$0xff] %vm20_vm0, %v113_v16 }
  0xe0   :  { %v105_v17 = vld [vmem:[#allocation2 + $0x8] sm:$0xff] }
  0xe1   :  { %v114_v18 = vadd.f32 %v137_v14, %v105_v17 }
  0xe3   :  { %116 = vst.msk [vmem:[#allocation3 + $0x8] sm:$0xff] %vm20_vm0, %v114_v18 }
  0xe4   :  { %168 = shalt.err (!%p165_p4)
}
  0xe5   :  { %s182_s21 = smov 128   ;;  %s183_s2 = smov 8  }
  0xe6   :  { %128 = dma.vmem_to_hbm [thread:$0]  %s123_s19, 256, %s231_s3, [#allocation4], %s182_s21, %s182_s21, %s183_s2  }
  0xe7   :  { %177 = dma.done.wait [#allocation4], 256  }
  0xe8   :  { %178 = vsyncadd [#allocation4], 4294967040 }
  0xe9   :  { %132 = vsyncpa [#allocation4], 1 }

// kernel: transformer_layer_forward.8
= control target key start
LH: loop header
LB: loop body
LE: loop exit
PB: predicated region body
PF: predicated region fallthrough
CT: control target
= control target key end

     0   :  { %v2175_v10 = vmov 1983009808   ;;  %v58_v12 = vlaneseq  ;;  %v2176_v17 = vmov 1934713408   ;;  %v2177_v34 = vmov 0.0   ;;  %s2666_s1 = inlined_call_operand.vmem [shape: bf16[8,8,8], index: 1, kind: input, shape index: {}]   ;;  %s2667_s0 = inlined_call_operand.vmem [shape: bf16[8,8,8], index: 0, kind: input, shape index: {}]   ;;  %s2668_s2 = inlined_call_operand.vmem [shape: bf16[8,8,8], index: 2, kind: input, shape index: {}]   ;;  %s2669_s3 = inlined_call_operand.vmem [shape: bf16[8,8,8], index: 3, kind: output, shape index: {}]  }
   0x1   :  { %v40_v0 = vld [vmem:[%s2666_s1 + $0x8] sm:$0xf]  ;;  %v38_v1 = vld [vmem:[%s2666_s1] sm:$0xf]  ;;  %v41_v2 = vld [vmem:[%s2666_s1 + $0xc] sm:$0xf]  ;;  %v56_v11 = vunpack.c.l.s4 %v2175_v10  ;;  %v73_v18 = vunpack.c.l.s4 %v2176_v17  ;;  %2045 = vmatprep.subr.bf16.mxu0 %v2177_v34  ;;  %2051 = vmatprep.subr.bf16.mxu1 %v2177_v34 }
   0x2   :  { %178 = vxpose.xlu1.c.b16.start.end [1/1] (short) (narrow) %v40_v0, 16  ;;  %146 = vxpose.xlu0.c.b16.start.end [1/1] (short) (narrow) %v38_v1, 16  ;;  %v39_v3 = vld [vmem:[%s2666_s1 + $0x4] sm:$0xf]  ;;  %v43_v4 = vld [vmem:[%s2666_s1 + $0x14] sm:$0xf] }
   0x3   :  { %v42_v5 = vld [vmem:[%s2666_s1 + $0x10] sm:$0xf]  ;;  %v45_v6 = vld [vmem:[%s2666_s1 + $0x1c] sm:$0xf]  ;;  %v44_v7 = vld [vmem:[%s2666_s1 + $0x18] sm:$0xf]  ;;  %v57_v15 = vunpack.c.0.s8 %v56_v11  ;;  %v74_v23 = vunpack.c.0.s8 %v73_v18 }
   0x4   :  { %v2226_v16 = vshrl.u32 %v58_v12, 7  ;;  %vm2178_vm0 = vmmov 0   ;;  %v2179_v49 = vmov 0   ;;  %vm19_vm1 = vcmask 64512  }
   0x5   :  { %2047 = vmatprep.mubr.msk.bf16.mxu0 %vm2178_vm0, %v2177_v34  ;;  %2053 = vmatprep.mubr.msk.bf16.mxu1 %vm2178_vm0, %v2177_v34  ;;  %21 = vst.msk [vmem:[#allocation3] sm:$0xff] %vm19_vm1, %v2177_v34  ;;  %22 = vst.msk [vmem:[#allocation4] sm:$0xff] %vm19_vm1, %v2177_v34  ;;  %vm598_vm2 = vcmask 1043456   ;;  %vm1031_vm3 = vcmask 1041409   ;;  %vm1033_vm4 = vcmask 1042434   ;;  %vm1035_vm5 = vcmask 1043459  }
   0x6   :  { %194 = vxpose.xlu1.c.b16.start.end [1/1] (short) (narrow) %v41_v2, 16  ;;  %162 = vxpose.xlu0.c.b16.start.end [1/1] (short) (narrow) %v39_v3, 16  ;;  %v2229_v21 = vsub.s32 %v57_v15, %v2226_v16  ;;  %v2233_v30 = vsub.s32 %v74_v23, %v2226_v16  ;;  %23 = vst.msk [vmem:[#allocation4 + $0x8] sm:$0xff] %vm19_vm1, %v2177_v34  ;;  %24 = vst.msk [vmem:[#allocation4 + $0x10] sm:$0xff] %vm19_vm1, %v2177_v34  ;;  %v2147_v3 = vld [vmem:[%s2667_s0] ss:$16 sps:$4 sm:$0xff]  }
   0x7   :  { %25 = vst.msk [vmem:[#allocation4 + $0x18] sm:$0xff] %vm19_vm1, %v2177_v34  ;;  %26 = vst.msk [vmem:[#allocation4 + $0x20] sm:$0xff] %vm19_vm1, %v2177_v34  ;;  %vm1037_vm6 = vcmask 1044484   ;;  %vm1039_vm7 = vcmask 1045509   ;;  %vm1041_vm8 = vcmask 1046534   ;;  %vm1043_vm9 = vcmask 1047559  }
   0x8   :  { %27 = vst.msk [vmem:[#allocation4 + $0x28] sm:$0xff] %vm19_vm1, %v2177_v34  ;;  %28 = vst.msk [vmem:[#allocation4 + $0x30] sm:$0xff] %vm19_vm1, %v2177_v34  ;;  %v2283_v10 = vrot.slane %v2147_v3, %v2229_v21  ;;  %vm1984_vm10 = vcmask 60416  }
   0x9   :  { %29 = vst.msk [vmem:[#allocation4 + $0x38] sm:$0xff] %vm19_vm1, %v2177_v34 }
   0xa   :  { %226 = vxpose.xlu1.c.b16.start.end [1/1] (short) (narrow) %v43_v4, 16  ;;  %210 = vxpose.xlu0.c.b16.start.end [1/1] (short) (narrow) %v42_v5, 16  ;;  %v2148_v5 = vld [vmem:[%s2667_s0 + $0x8] ss:$16 sps:$4 sm:$0xff]  }
   0xb   :  { %v2286_v11 = vrot.slane %v2148_v5, %v2229_v21 }
   0xe   :  { %258 = vxpose.xlu1.c.b16.start.end [1/1] (short) (narrow) %v45_v6, 16  ;;  %242 = vxpose.xlu0.c.b16.start.end [1/1] (short) (narrow) %v44_v7, 16  ;;  %v2149_v6 = vld [vmem:[%s2667_s0 + $0x4] ss:$16 sps:$4 sm:$0xff]   ;;  %v2150_v7 = vld [vmem:[%s2667_s0 + $0xc] ss:$16 sps:$4 sm:$0xff]  }
  0x64   :  { %v186_v8 = vpop.trf.xlu1  ;;  %v154_v9 = vpop.trf.xlu0 }
  0x68   :  { %v202_v13 = vpop.trf.xlu1  ;;  %v170_v14 = vpop.trf.xlu0 }
  0x6c   :  { %v234_v19 = vpop.trf.xlu1  ;;  %v218_v20 = vpop.trf.xlu0 }
  0x6d   :  { %v308_v22 = vcombine.low %v170_v14, %v234_v19  ;;  %v274_v24 = vcombine.low %v154_v9, %v218_v20  ;;  %v2292_v14 = vrot.slane %v2150_v7, %v2229_v21 }
  0x6f   :  { %v315_v29 = vrot.slane %v308_v22, %v2229_v21  ;;  %v281_v31 = vrot.slane %v274_v24, %v2229_v21  ;;  %v70_v22 = vcombine.low %v2283_v10, %v2286_v11 }
  0x70   :  { %v266_v25 = vpop.trf.xlu1  ;;  %v250_v26 = vpop.trf.xlu0 }
  0x71   :  { %v316_v27 = vcombine.low %v202_v13, %v266_v25  ;;  %v282_v28 = vcombine.low %v186_v8, %v250_v26  ;;  %v2289_v13 = vrot.slane %v2149_v6, %v2229_v21 }
  0x73   :  { %v323_v32 = vrot.slane %v316_v27, %v2229_v21  ;;  %v289_v33 = vrot.slane %v282_v28, %v2229_v21  ;;  %v104_v23 = vcombine.low %v2289_v13, %v2292_v14 }
  0x75   :  { %v324_v35 = vcombine.low %v315_v29, %v323_v32  ;;  %v325_v36 = vcombine.high %v315_v29, %v323_v32  ;;  %v290_v37 = vcombine.low %v281_v31, %v289_v33  ;;  %v291_v38 = vcombine.high %v281_v31, %v289_v33 }
  0x76   :  { %v78_v31 = vrot.slane %v70_v22, %v2233_v30  ;;  %v112_v32 = vrot.slane %v104_v23, %v2233_v30 }
  0x77   :  { %v298_v39 = vrot.slane %v290_v37, %v2233_v30  ;;  %v332_v40 = vrot.slane %v324_v35, %v2233_v30  ;;  %v305_v41 = vrot.slane %v291_v38, %v2233_v30  ;;  %v339_v42 = vrot.slane %v325_v36, %v2233_v30 }
  0x79   :  { %v344_v43 = vpack.i.b16 %v332_v40, %v298_v39  ;;  %v346_v44 = vshrl.u32 %v298_v39, 16  ;;  %v347_v45 = vshrl.u32 %v332_v40, 16  ;;  %v362_v46 = vshrl.u32 %v305_v41, 16 }
  0x7a   :  { %v363_v47 = vshrl.u32 %v339_v42, 16  ;;  %v306_v50 = vcombine.high %v298_v39, %v2179_v49  ;;  %v340_v51 = vcombine.high %v332_v40, %v2179_v49  ;;  %v360_v52 = vpack.i.b16 %v339_v42, %v305_v41 }
  0x7b   :  { %374 = vxpose.xlu0.c.b16.start.end [1/1] (short) (narrow) %v344_v43, 16  ;;  %v348_v48 = vpack.i.b16 %v347_v45, %v346_v44  ;;  %v307_v53 = vcombine.high %v305_v41, %v2179_v49  ;;  %v341_v57 = vcombine.high %v339_v42, %v2179_v49  ;;  %v125_v39 = vshrl.u32 %v78_v31, 16 }
  0x7c   :  { %v364_v54 = vpack.i.b16 %v363_v47, %v362_v46  ;;  %v354_v55 = vshrl.u32 %v306_v50, 16  ;;  %v355_v56 = vshrl.u32 %v340_v51, 16  ;;  %v352_v58 = vpack.i.b16 %v340_v51, %v306_v50 }
  0x7d   :  { %390 = vxpose.xlu1.c.b16.start.end [1/1] (short) (narrow) %v348_v48, 16  ;;  %v370_v60 = vshrl.u32 %v307_v53, 16  ;;  %v371_v61 = vshrl.u32 %v341_v57, 16  ;;  %v368_v62 = vpack.i.b16 %v341_v57, %v307_v53  ;;  %v126_v40 = vshrl.u32 %v112_v32, 16 }
  0x7e   :  { %v356_v59 = vpack.i.b16 %v355_v56, %v354_v55  ;;  %v124_v46 = vpack.i.b16 %v112_v32, %v78_v31  ;;  %v86_v53 = vcombine.high %v78_v31, %v2179_v49 }
  0x7f   :  { %438 = vxpose.xlu0.c.b16.start.end [1/1] (short) (narrow) %v360_v52, 16  ;;  %v372_v63 = vpack.i.b16 %v371_v61, %v370_v60  ;;  %v127_v57 = vpack.i.b16 %v126_v40, %v125_v39  ;;  %v71_v61 = vcombine.high %v2283_v10, %v2286_v11 }
  0x81   :  { %454 = vxpose.xlu1.c.b16.start.end [1/1] (short) (narrow) %v364_v54, 16  ;;  %v120_v54 = vcombine.high %v112_v32, %v2179_v49  ;;  %v85_v6 = vrot.slane %v71_v61, %v2233_v30 }
  0x83   :  { %406 = vxpose.xlu0.c.b16.start.end [1/1] (short) (narrow) %v352_v58, 16  ;;  %v130_v3 = vpack.i.b16 %v120_v54, %v86_v53 }
  0x85   :  { %422 = vxpose.xlu1.c.b16.start.end [1/1] (short) (narrow) %v356_v59, 16 }
  0x87   :  { %470 = vxpose.xlu0.c.b16.start.end [1/1] (short) (narrow) %v368_v62, 16  ;;  %v105_v62 = vcombine.high %v2289_v13, %v2292_v14 }
  0x89   :  { %486 = vxpose.xlu1.c.b16.start.end [1/1] (short) (narrow) %v372_v63, 16 }
  0xdd   :  { %v382_v0 = vpop.trf.xlu0 }
  0xdf   :  { %v398_v1 = vpop.trf.xlu1 }
  0xe1   :  { %v446_v2 = vpop.trf.xlu0 }
  0xe2   :  { %v502_v15 = vcombine.low %v382_v0, %v446_v2  ;;  %v131_v0 = vshrl.u32 %v86_v53, 16 }
  0xe3   :  { %v462_v4 = vpop.trf.xlu1 }
  0xe4   :  { %v536_v18 = vcombine.low %v398_v1, %v462_v4  ;;  %v509_v24 = vrot.slane %v502_v15, %v2229_v21  ;;  %v132_v1 = vshrl.u32 %v120_v54, 16  ;;  %v137_v15 = vshrl.u32 %v85_v6, 16 }
  0xe5   :  { %v414_v8 = vpop.trf.xlu0 }
  0xe6   :  { %v543_v27 = vrot.slane %v536_v18, %v2229_v21  ;;  %v133_v7 = vpack.i.b16 %v132_v1, %v131_v0 }
  0xe7   :  { %v430_v9 = vpop.trf.xlu1 }
  0xe9   :  { %v478_v17 = vpop.trf.xlu0 }
  0xea   :  { %v510_v19 = vcombine.low %v414_v8, %v478_v17 }
  0xeb   :  { %v494_v20 = vpop.trf.xlu1 }
  0xec   :  { %v517_v25 = vrot.slane %v510_v19, %v2229_v21  ;;  %v544_v26 = vcombine.low %v430_v9, %v494_v20  ;;  %v119_v9 = vrot.slane %v105_v62, %v2233_v30 }
  0xee   :  { %v518_v28 = vcombine.low %v509_v24, %v517_v25  ;;  %v551_v29 = vrot.slane %v544_v26, %v2229_v21  ;;  %v519_v45 = vcombine.high %v509_v24, %v517_v25  ;;  %v138_v17 = vshrl.u32 %v119_v9, 16 }
  0xef   :  { %v136_v19 = vpack.i.b16 %v119_v9, %v85_v6  ;;  %v87_v25 = vcombine.high %v85_v6, %v2179_v49  ;;  %v121_v26 = vcombine.high %v119_v9, %v2179_v49 }
  0xf0   :  { %v526_v33 = vrot.slane %v518_v28, %v2233_v30  ;;  %v552_v35 = vcombine.low %v543_v27, %v551_v29  ;;  %v553_v38 = vcombine.high %v543_v27, %v551_v29  ;;  %v533_v59 = vrot.slane %v519_v45, %v2233_v30 }
  0xf1   :  { %v139_v23 = vpack.i.b16 %v138_v17, %v137_v15  ;;  %v143_v29 = vshrl.u32 %v87_v25, 16  ;;  %v144_v31 = vshrl.u32 %v121_v26, 16  ;;  %v142_v32 = vpack.i.b16 %v121_v26, %v87_v25 }
  0xf2   :  { %v560_v36 = vrot.slane %v552_v35, %v2233_v30  ;;  %v534_v37 = vcombine.high %v526_v33, %v2179_v49  ;;  %v573_v42 = vshrl.u32 %v526_v33, 16  ;;  %v567_v55 = vrot.slane %v553_v38, %v2233_v30 }
  0xf3   :  { %v585_v5 = vshrl.u32 %v533_v59, 16  ;;  %v535_v13 = vcombine.high %v533_v59, %v2179_v49 }
  0xf4   :  { %v572_v41 = vpack.i.b16 %v560_v36, %v526_v33  ;;  %v574_v43 = vshrl.u32 %v560_v36, 16  ;;  %v568_v44 = vcombine.high %v560_v36, %v2179_v49  ;;  %v579_v47 = vshrl.u32 %v534_v37, 16 }
  0xf5   :  { %v586_v2 = vshrl.u32 %v567_v55, 16  ;;  %v584_v4 = vpack.i.b16 %v567_v55, %v533_v59  ;;  %v569_v10 = vcombine.high %v567_v55, %v2179_v49  ;;  %v591_v22 = vshrl.u32 %v535_v13, 16 }
  0xf6   :  { %v600_v48 = vsel %vm598_vm2, %v572_v41, 0  ;;  %v575_v50 = vpack.i.b16 %v574_v43, %v573_v42  ;;  %v578_v51 = vpack.i.b16 %v568_v44, %v534_v37  ;;  %v580_v52 = vshrl.u32 %v568_v44, 16 }
  0xf7   :  { %2046 = vmatpush3.bf16.msra.mxu0 %v600_v48  ;;  %v587_v8 = vpack.i.b16 %v586_v2, %v585_v5  ;;  %v784_v11 = vsel %vm598_vm2, %v584_v4, 0  ;;  %v592_v18 = vshrl.u32 %v569_v10, 16  ;;  %v590_v20 = vpack.i.b16 %v569_v10, %v535_v13 }
  0xf8   :  { %v646_v56 = vsel %vm598_vm2, %v575_v50, 0  ;;  %2057 = vmatprep.subr.bf16.mxu0 %v2177_v34  ;;  %v581_v58 = vpack.i.b16 %v580_v52, %v579_v47  ;;  %v692_v60 = vsel %vm598_vm2, %v578_v51, 0  ;;  %v145_v33 = vpack.i.b16 %v144_v31, %v143_v29 }
  0xf9   :  { %2052 = vmatpush3.bf16.msra.mxu1 %v646_v56  ;;  %v830_v14 = vsel %vm598_vm2, %v587_v8, 0  ;;  %v593_v24 = vpack.i.b16 %v592_v18, %v591_v22  ;;  %v876_v27 = vsel %vm598_vm2, %v590_v20, 0  ;;  %v2180_v13 = vmov -inf  }
  0xfa   :  { %2048 = vmatmul.mubr.msk.bf16.vlgmr.msra.gmra.mxu0 %vm19_vm1, %v124_v46  ;;  %2063 = vmatprep.subr.bf16.mxu1 %v2177_v34  ;;  %v738_v63 = vsel %vm598_vm2, %v581_v58, 0  ;;  %20 = vst.msk [vmem:[#allocation2] sm:$0xff] %vm19_vm1, %v2180_v13 }
  0xfb   :  { %2058 = vmatpush3.bf16.msra.mxu0 %v692_v60  ;;  %2059 = vmatprep.mubr.msk.bf16.mxu0 %vm2178_vm0, %v2177_v34  ;;  %v922_v28 = vsel %vm598_vm2, %v593_v24, 0 }
  0xfc   :  { %2054 = vmatmul.mubr.msk.bf16.vlgmr.msra.gmra.mxu1 %vm19_vm1, %v127_v57  ;;  %2069 = vmatprep.subr.bf16.mxu0 %v2177_v34 }
  0xfd   :  { %2064 = vmatpush3.bf16.msra.mxu1 %v738_v63  ;;  %2065 = vmatprep.mubr.msk.bf16.mxu1 %vm2178_vm0, %v2177_v34 }
  0xfe   :  { %2075 = vmatprep.subr.bf16.mxu1 %v2177_v34 }
 0x102   :  { %2060 = vmatmul.mubr.msk.bf16.vlgmr.msra.gmra.mxu0 %vm19_vm1, %v130_v3 }
 0x103   :  { %2070 = vmatpush3.bf16.msra.mxu0 %v784_v11  ;;  %2071 = vmatprep.mubr.msk.bf16.mxu0 %vm2178_vm0, %v2177_v34 }
 0x104   :  { %2066 = vmatmul.mubr.msk.bf16.vlgmr.msra.gmra.mxu1 %vm19_vm1, %v133_v7  ;;  %2081 = vmatprep.subr.bf16.mxu0 %v2177_v34 }
 0x105   :  { %2076 = vmatpush3.bf16.msra.mxu1 %v830_v14  ;;  %2077 = vmatprep.mubr.msk.bf16.mxu1 %vm2178_vm0, %v2177_v34  ;;  %v998_v14 = vand.u32 127, %v58_v12 }
 0x106   :  { %2087 = vmatprep.subr.bf16.mxu1 %v2177_v34 }
 0x107   :  { %v2397_v17 = vsub.s32 %v998_v14, %v2226_v16 }
 0x10a   :  { %2072 = vmatmul.mubr.msk.bf16.vlgmr.msra.gmra.mxu0 %vm19_vm1, %v136_v19 }
 0x10b   :  { %2082 = vmatpush3.bf16.msra.mxu0 %v876_v27  ;;  %2083 = vmatprep.mubr.msk.bf16.mxu0 %vm2178_vm0, %v2177_v34 }
 0x10c   :  { %2078 = vmatmul.mubr.msk.bf16.vlgmr.msra.gmra.mxu1 %vm19_vm1, %v139_v23  ;;  %2093 = vmatprep.subr.bf16.mxu0 %v2177_v34 }
 0x10d   :  { %2088 = vmatpush3.bf16.msra.mxu1 %v922_v28  ;;  %2089 = vmatprep.mubr.msk.bf16.mxu1 %vm2178_vm0, %v2177_v34 }
 0x10e   :  { %2099 = vmatprep.subr.bf16.mxu1 %v2177_v34 }
 0x112   :  { %2084 = vmatmul.mubr.msk.bf16.vlgmr.msra.gmra.mxu0 %vm19_vm1, %v142_v32 }
 0x113   :  { %2095 = vmatprep.mubr.msk.bf16.mxu0 %vm2178_vm0, %v2177_v34 }
 0x114   :  { %2090 = vmatmul.mubr.msk.bf16.vlgmr.msra.gmra.mxu1 %vm19_vm1, %v145_v33 }
 0x115   :  { %2101 = vmatprep.mubr.msk.bf16.mxu1 %vm2178_vm0, %v2177_v34 }
 0x1ba   :  { %v2362_v35 = vpop.f32.mrf.mxu0 }
 0x1bb   :  { %v965_v36 = vsel %vm19_vm1, %v2362_v35, -inf }
 0x1bc   :  { %v2049_v37 = vpop.f32.mrf.mxu0  ;;  %v2366_v38 = vpop.f32.mrf.mxu1  ;;  %966 = vmax.xlane.f32.xlu0 %v965_v36 }
 0x1bd   :  { %v968_v39 = vsel %vm19_vm1, %v2366_v38, -inf }
 0x1be   :  { %969 = vmax.xlane.f32.xlu1 %v968_v39  ;;  %v2055_v40 = vpop.f32.mrf.mxu1  ;;  %v639_v41 = vpop.f32.mrf.mxu0 }
 0x1bf   :  { %v2411_v40 = vld [vmem:[#allocation2] sm:$0xff] }
 0x1c0   :  { %v2050_v42 = vpop.f32.mrf.mxu0  ;;  %v685_v43 = vpop.f32.mrf.mxu1 }
 0x1c1   :  { %v2414_v42 = vsub.s32 1, %v2226_v16  ;;  %v2417_v43 = vsub.s32 0, %v2226_v16 }
 0x1c2   :  { %v2056_v44 = vpop.f32.mrf.mxu1  ;;  %v2370_v45 = vpop.f32.mrf.mxu0 }
 0x1c3   :  { %v971_v46 = vsel %vm19_vm1, %v2370_v45, -inf }
 0x1c4   :  { %v2374_v47 = vpop.f32.mrf.mxu1  ;;  %972 = vmax.xlane.f32.xlu0 %v971_v46  ;;  %v2061_v48 = vpop.f32.mrf.mxu0 }
 0x1c5   :  { %v974_v50 = vsel %vm19_vm1, %v2374_v47, -inf }
 0x1c6   :  { %975 = vmax.xlane.f32.xlu1 %v974_v50  ;;  %v731_v51 = vpop.f32.mrf.mxu0  ;;  %v2067_v52 = vpop.f32.mrf.mxu1  ;;  %v2151_v50 = vld [vmem:[%s2668_s2] ss:$16 sps:$4 sm:$0xff]  }
 0x1c7   :  { %v2152_v52 = vld [vmem:[%s2668_s2 + $0x8] ss:$16 sps:$4 sm:$0xff]  }
 0x1c8   :  { %v2062_v53 = vpop.f32.mrf.mxu0  ;;  %v777_v54 = vpop.f32.mrf.mxu1 }
 0x1c9   :  { %v2153_v53 = vld [vmem:[%s2668_s2 + $0x4] ss:$16 sps:$4 sm:$0xff]   ;;  %v2435_v54 = vsub.s32 2, %v2226_v16 }
 0x1ca   :  { %v2068_v55 = vpop.f32.mrf.mxu1  ;;  %v2378_v56 = vpop.f32.mrf.mxu0 }
 0x1cb   :  { %v977_v57 = vsel %vm19_vm1, %v2378_v56, -inf  ;;  %v2438_v55 = vsub.s32 4, %v2226_v16 }
 0x1cc   :  { %v2382_v58 = vpop.f32.mrf.mxu1  ;;  %978 = vmax.xlane.f32.xlu0 %v977_v57  ;;  %v2073_v59 = vpop.f32.mrf.mxu0  ;;  %v2154_v57 = vld [vmem:[%s2668_s2 + $0xc] ss:$16 sps:$4 sm:$0xff]  }
 0x1cd   :  { %v980_v60 = vsel %vm19_vm1, %v2382_v58, -inf }
 0x1ce   :  { %981 = vmax.xlane.f32.xlu1 %v980_v60  ;;  %v823_v61 = vpop.f32.mrf.mxu0  ;;  %v2079_v62 = vpop.f32.mrf.mxu1 }
 0x1cf   :  { %v1293_v62 = vrot.slane %v2151_v50, %v2229_v21 }
 0x1d0   :  { %v2074_v63 = vpop.f32.mrf.mxu0  ;;  %v869_v0 = vpop.f32.mrf.mxu1 }
 0x1d1   :  { %v1301_v63 = vrot.slane %v2152_v52, %v2229_v21  ;;  %v1327_v0 = vrot.slane %v2153_v53, %v2229_v21 }
 0x1d2   :  { %v2080_v1 = vpop.f32.mrf.mxu1  ;;  %v2386_v2 = vpop.f32.mrf.mxu0 }
 0x1d3   :  { %v983_v3 = vsel %vm19_vm1, %v2386_v2, -inf  ;;  %v2455_v1 = vsub.s32 3, %v2226_v16 }
 0x1d4   :  { %v2390_v4 = vpop.f32.mrf.mxu1  ;;  %984 = vmax.xlane.f32.xlu0 %v983_v3  ;;  %v2085_v5 = vpop.f32.mrf.mxu0  ;;  %v1335_v3 = vrot.slane %v2154_v57, %v2229_v21 }
 0x1d5   :  { %v986_v6 = vsel %vm19_vm1, %v2390_v4, -inf }
 0x1d6   :  { %987 = vmax.xlane.f32.xlu1 %v986_v6  ;;  %v915_v7 = vpop.f32.mrf.mxu0  ;;  %v2091_v8 = vpop.f32.mrf.mxu1 }
 0x1d7   :  { %v2463_v7 = vsub.s32 6, %v2226_v16  ;;  %v1302_v8 = vcombine.low %v1293_v62, %v1301_v63 }
 0x1d8   :  { %v2086_v9 = vpop.f32.mrf.mxu0  ;;  %v961_v10 = vpop.f32.mrf.mxu1 }
 0x1d9   :  { %v1336_v9 = vcombine.low %v1327_v0, %v1335_v3  ;;  %v1310_v10 = vrot.slane %v1302_v8, %v2233_v30 }
 0x1da   :  { %v2092_v11 = vpop.f32.mrf.mxu1 }
 0x1db   :  { %v1344_v11 = vrot.slane %v1336_v9, %v2233_v30 }
 0x245   :  { %v967_v15 = vpop.xlane.xlu0 %966 }
 0x246   :  { %v1002_v22 = vrot.slane %v967_v15, %v2397_v17  ;;  %v2472_v15 = vsub.s32 5, %v2226_v16 }
 0x247   :  { %v970_v18 = vpop.xlane.xlu1 %969 }
 0x248   :  { %v1006_v20 = vrot.slane %v970_v18, %v2397_v17  ;;  %v1357_v18 = vshrl.u32 %v1310_v10, 16 }
 0x24a   :  { %v1032_v26 = vsel %vm1031_vm3, %v1006_v20, %v1002_v22  ;;  %v1358_v20 = vshrl.u32 %v1344_v11, 16  ;;  %v2475_v22 = vcombine.high %v1310_v10, %v2179_v49 }
 0x24d   :  { %v973_v19 = vpop.xlane.xlu0 %972 }
 0x24e   :  { %v1010_v23 = vrot.slane %v973_v19, %v2397_v17  ;;  %v1356_v19 = vpack.i.b16 %v1344_v11, %v1310_v10 }
 0x24f   :  { %v976_v24 = vpop.xlane.xlu1 %975 }
 0x250   :  { %v1014_v12 = vrot.slane %v976_v24, %v2397_v17  ;;  %v1034_v27 = vsel %vm1033_vm4, %v1010_v23, %v1032_v26  ;;  %v2478_v23 = vcombine.high %v1344_v11, %v2179_v49  ;;  %v1382_v24 = vsel %vm598_vm2, %v1356_v19, 0 }
 0x251   :  { %v1363_v26 = vshrl.u32 %v2475_v22, 16  ;;  %2094 = vmatpush3.bf16.msra.mxu0 %v1382_v24 }
 0x252   :  { %v1036_v31 = vsel %vm1035_vm5, %v1014_v12, %v1034_v27  ;;  %v1364_v12 = vshrl.u32 %v2478_v23, 16  ;;  %2105 = vmatprep.subr.bf16.mxu0 %v2177_v34 }
 0x255   :  { %v979_v25 = vpop.xlane.xlu0 %978 }
 0x256   :  { %v1018_v28 = vrot.slane %v979_v25, %v2397_v17  ;;  %v1359_v25 = vpack.i.b16 %v1358_v20, %v1357_v18 }
 0x257   :  { %v982_v29 = vpop.xlane.xlu1 %981 }
 0x258   :  { %v1022_v32 = vrot.slane %v982_v29, %v2397_v17  ;;  %v1038_v33 = vsel %vm1037_vm6, %v1018_v28, %v1036_v31  ;;  %v2486_v28 = vsub.s32 7, %v2226_v16  ;;  %v1428_v29 = vsel %vm598_vm2, %v1359_v25, 0 }
 0x259   :  { %v1362_v31 = vpack.i.b16 %v2478_v23, %v2475_v22  ;;  %2100 = vmatpush3.bf16.msra.mxu1 %v1428_v29 }
 0x25a   :  { %v1040_v39 = vsel %vm1039_vm7, %v1022_v32, %v1038_v33  ;;  %v1365_v32 = vpack.i.b16 %v1364_v12, %v1363_v26  ;;  %2111 = vmatprep.subr.bf16.mxu1 %v2177_v34  ;;  %v1303_v33 = vcombine.high %v1293_v62, %v1301_v63 }
 0x25c   :  { %v2496_v16 = vrot.slane %v1303_v33, %v2233_v30  ;;  %v1520_v29 = vsel %vm598_vm2, %v1365_v32, 0  ;;  %v1474_v33 = vsel %vm598_vm2, %v1362_v31, 0 }
 0x25d   :  { %v985_v36 = vpop.xlane.xlu0 %984 }
 0x25e   :  { %v1026_v37 = vrot.slane %v985_v36, %v2397_v17  ;;  %v1337_v36 = vcombine.high %v1327_v0, %v1335_v3  ;;  %v2509_v50 = vcombine.high %v2496_v16, %v2179_v49 }
 0x25f   :  { %v988_v41 = vpop.xlane.xlu1 %987 }
 0x260   :  { %v1042_v44 = vsel %vm1041_vm8, %v1026_v37, %v1040_v39  ;;  %v1030_v46 = vrot.slane %v988_v41, %v2397_v17  ;;  %v2499_v39 = vrot.slane %v1337_v36, %v2233_v30  ;;  %v1369_v41 = vshrl.u32 %v2496_v16, 16 }
 0x261   :  { %v1375_v57 = vshrl.u32 %v2509_v50, 16 }
 0x262   :  { %v1044_v48 = vsel %vm1043_vm9, %v1030_v46, %v1042_v44  ;;  %v1370_v44 = vshrl.u32 %v2499_v39, 16  ;;  %v1368_v46 = vpack.i.b16 %v2499_v39, %v2496_v16  ;;  %v2513_v52 = vcombine.high %v2499_v39, %v2179_v49 }
 0x263   :  { %v2426_v51 = vmax.f32 %v2411_v40, %v1044_v48 }
 0x264   :  { %v2505_v48 = vpack.i.b16 %v1370_v44, %v1369_v41  ;;  %v1374_v53 = vpack.i.b16 %v2513_v52, %v2509_v50 }
 0x265   :  { %v1047_v59 = vsub.f32 %v2411_v40, %v2426_v51  ;;  %1762 = vst.msk [vmem:[#allocation2] sm:$0xff] %vm19_vm1, %v2426_v51  ;;  %v1060_v60 = vrot.slane %v2426_v51, %v2414_v42  ;;  %v1053_v61 = vrot.slane %v2426_v51, %v2417_v43  ;;  %v1067_v5 = vrot.slane %v2426_v51, %v2435_v54 }
 0x266   :  { %v1081_v6 = vrot.slane %v2426_v51, %v2438_v55  ;;  %v1074_v13 = vrot.slane %v2426_v51, %v2455_v1  ;;  %v1095_v14 = vrot.slane %v2426_v51, %v2463_v7  ;;  %v1088_v27 = vrot.slane %v2426_v51, %v2472_v15 }
 0x267   :  { %1062 = vbcast.lane.b32.xlu1 %v1060_v60, 256  ;;  %1055 = vbcast.lane.b32.xlu0 %v1053_v61, 256  ;;  %v1102_v37 = vrot.slane %v2426_v51, %v2486_v28  ;;  %v1376_v60 = vshrl.u32 %v2513_v52, 16  ;;  %v1612_v41 = vsel %vm598_vm2, %v2505_v48, 0 }
 0x269   :  { %v2519_v61 = vpack.i.b16 %v1376_v60, %v1375_v57  ;;  %v1566_v57 = vsel %vm598_vm2, %v1368_v46, 0 }
 0x26b   :  { %1069 = vbcast.lane.b32.xlu1 %v1067_v5, 256  ;;  %1083 = vbcast.lane.b32.xlu0 %v1081_v6, 256 }
 0x26f   :  { %1076 = vbcast.lane.b32.xlu1 %v1074_v13, 256  ;;  %1097 = vbcast.lane.b32.xlu0 %v1095_v14, 256 }
 0x273   :  { %1090 = vbcast.lane.b32.xlu1 %v1088_v27, 256 }
 0x277   :  { %1104 = vbcast.lane.b32.xlu1 %v1102_v37, 256 }
 0x2d9   :  { %v1063_v62 = vpop.permute.xlu1 %1062  ;;  %v1056_v63 = vpop.permute.xlu0 %1055 }
 0x2da   :  { %v1107_v0 = vsub.f32 %v2366_v38, %v1063_v62  ;;  %v1106_v3 = vsub.f32 %v2362_v35, %v1056_v63  ;;  %v1048_v63 = vmul.f32 1.442695, %v1047_v59  ;;  %v1704_v59 = vsel %vm598_vm2, %v2519_v61, 0 }
 0x2dc   :  { %v1116_v5 = vmul.f32 1.442695, %v1107_v0  ;;  %v1114_v6 = vmul.f32 1.442695, %v1106_v3 }
 0x2dd   :  { %v1070_v8 = vpop.permute.xlu1 %1069  ;;  %v1084_v49 = vpop.permute.xlu0 %1083 }
 0x2de   :  { %2155 = vpow2.f32 %v1116_v5  ;;  %v1108_v9 = vsub.f32 %v2370_v45, %v1070_v8  ;;  %v1110_v11 = vsub.f32 %v2378_v56, %v1084_v49  ;;  %v1658_v5 = vsel %vm598_vm2, %v1374_v53, 0 }
 0x2df   :  { %2157 = vpow2.f32 %v1114_v6 }
 0x2e0   :  { %v1118_v10 = vmul.f32 1.442695, %v1108_v9  ;;  %v1122_v38 = vmul.f32 1.442695, %v1110_v11 }
 0x2e1   :  { %v1077_v13 = vpop.permute.xlu1 %1076  ;;  %v1098_v18 = vpop.permute.xlu0 %1097 }
 0x2e2   :  { %2159 = vpow2.f32 %v1118_v10  ;;  %v1109_v14 = vsub.f32 %v2374_v47, %v1077_v13  ;;  %v1112_v35 = vsub.f32 %v2386_v2, %v1098_v18 }
 0x2e4   :  { %v1120_v19 = vmul.f32 1.442695, %v1109_v14  ;;  %v1126_v45 = vmul.f32 1.442695, %v1112_v35 }
 0x2e5   :  { %v1091_v20 = vpop.permute.xlu1 %1090 }
 0x2e6   :  { %2161 = vpow2.f32 %v1120_v19  ;;  %v1111_v22 = vsub.f32 %v2382_v58, %v1091_v20 }
 0x2e7   :  { %2163 = vpow2.f32 %v1122_v38 }
 0x2e8   :  { %v1124_v23 = vmul.f32 1.442695, %v1111_v22 }
 0x2e9   :  { %v1105_v24 = vpop.permute.xlu1 %1104 }
 0x2ea   :  { %2165 = vpow2.f32 %v1124_v23  ;;  %v1113_v56 = vsub.f32 %v2390_v4, %v1105_v24 }
 0x2eb   :  { %v2156_v25 = vpop.eup %2155  ;;  %2167 = vpow2.f32 %v1126_v45 }
 0x2ec   :  { %v2158_v26 = vpop.eup %2157  ;;  %v1128_v12 = vmul.f32 1.442695, %v1113_v56  ;;  %v1135_v47 = vsel %vm19_vm1, %v2156_v25, 0.0  ;;  %v1279_v27 = vpack.c.bf16 %v2156_v25, %v2156_v25 }
 0x2ed   :  { %1136 = vadd.xlane.f32.xlu1 %v1135_v47  ;;  %v1132_v2 = vsel %vm19_vm1, %v2158_v26, 0.0  ;;  %v1278_v58 = vpack.c.bf16 %v2158_v26, %v2158_v26 }
 0x2ee   :  { %2169 = vpow2.f32 %v1128_v12  ;;  %1133 = vadd.xlane.f32.xlu0 %v1132_v2  ;;  %2102 = vmatmul.mubr.msk.bf16.vlgmr.msra.gmra.mxu1 %vm19_vm1, %v1279_v27  ;;  %v1130_v2 = vld [vmem:[#allocation3] sm:$0xff] }
 0x2ef   :  { %v2160_v4 = vpop.eup %2159  ;;  %2096 = vmatmul.mubr.msk.bf16.vlgmr.msra.gmra.mxu0 %vm19_vm1, %v1278_v58  ;;  %2112 = vmatpush3.bf16.msra.mxu1 %v1520_v29  ;;  %2171 = vpow2.f32 %v1048_v63 }
 0x2f0   :  { %v1138_v36 = vsel %vm19_vm1, %v2160_v4, 0.0  ;;  %2106 = vmatpush3.bf16.msra.mxu0 %v1474_v33  ;;  %2107 = vmatprep.mubr.msk.bf16.mxu0 %vm2178_vm0, %v2177_v34  ;;  %v1280_v44 = vpack.c.bf16 %v2160_v4, %v2160_v4 }
 0x2f1   :  { %2113 = vmatprep.mubr.msk.bf16.mxu1 %vm2178_vm0, %v2177_v34  ;;  %2117 = vmatprep.subr.bf16.mxu0 %v2177_v34 }
 0x2f2   :  { %1139 = vadd.xlane.f32.xlu0 %v1138_v36  ;;  %2123 = vmatprep.subr.bf16.mxu1 %v2177_v34 }
 0x2f3   :  { %v2162_v31 = vpop.eup %2161 }
 0x2f4   :  { %v1141_v32 = vsel %vm19_vm1, %v2162_v31, 0.0  ;;  %v1281_v37 = vpack.c.bf16 %v2162_v31, %v2162_v31  ;;  %v2164_v60 = vpop.eup %2163 }
 0x2f5   :  { %v1144_v16 = vsel %vm19_vm1, %v2164_v60, 0.0  ;;  %v1282_v3 = vpack.c.bf16 %v2164_v60, %v2164_v60 }
 0x2f6   :  { %1142 = vadd.xlane.f32.xlu0 %v1141_v32  ;;  %2114 = vmatmul.mubr.msk.bf16.vlgmr.msra.gmra.mxu1 %vm19_vm1, %v1281_v37 }
 0x2f7   :  { %v2166_v62 = vpop.eup %2165  ;;  %2108 = vmatmul.mubr.msk.bf16.vlgmr.msra.gmra.mxu0 %vm19_vm1, %v1280_v44  ;;  %2124 = vmatpush3.bf16.msra.mxu1 %v1612_v41 }
 0x2f8   :  { %v1147_v48 = vsel %vm19_vm1, %v2166_v62, 0.0  ;;  %2118 = vmatpush3.bf16.msra.mxu0 %v1566_v57  ;;  %2125 = vmatprep.mubr.msk.bf16.mxu1 %vm2178_vm0, %v2177_v34  ;;  %v2168_v39 = vpop.eup %2167  ;;  %v1283_v51 = vpack.c.bf16 %v2166_v62, %v2166_v62 }
 0x2f9   :  { %1148 = vadd.xlane.f32.xlu1 %v1147_v48  ;;  %2119 = vmatprep.mubr.msk.bf16.mxu0 %vm2178_vm0, %v2177_v34  ;;  %v1150_v0 = vsel %vm19_vm1, %v2168_v39, 0.0  ;;  %v1284_v6 = vpack.c.bf16 %v2168_v39, %v2168_v39  ;;  %v1263_v48 = vld [vmem:[#allocation4 + $0x8] sm:$0xff] }
 0x2fa   :  { %1145 = vadd.xlane.f32.xlu0 %v1144_v16  ;;  %2129 = vmatprep.subr.bf16.mxu0 %v2177_v34  ;;  %v1262_v16 = vld [vmem:[#allocation4] sm:$0xff] }
 0x2fb   :  { %v2170_v46 = vpop.eup %2169  ;;  %2135 = vmatprep.subr.bf16.mxu1 %v2177_v34 }
 0x2fc   :  { %v1153_v40 = vsel %vm19_vm1, %v2170_v46, 0.0  ;;  %v1285_v61 = vpack.c.bf16 %v2170_v46, %v2170_v46  ;;  %v2172_v50 = vpop.eup %2171 }
 0x2fd   :  { %1154 = vadd.xlane.f32.xlu1 %v1153_v40  ;;  %v1216_v52 = vrot.slane %v2172_v50, %v2414_v42  ;;  %v1223_v53 = vrot.slane %v2172_v50, %v2435_v54  ;;  %v1209_v8 = vrot.slane %v2172_v50, %v2417_v43  ;;  %v1230_v49 = vrot.slane %v2172_v50, %v2455_v1 }
 0x2fe   :  { %1151 = vadd.xlane.f32.xlu0 %v1150_v0  ;;  %2126 = vmatmul.mubr.msk.bf16.vlgmr.msra.gmra.mxu1 %vm19_vm1, %v1283_v51  ;;  %v1244_v9 = vrot.slane %v2172_v50, %v2472_v15  ;;  %v1251_v10 = vrot.slane %v2172_v50, %v2463_v7  ;;  %v1258_v11 = vrot.slane %v2172_v50, %v2486_v28 }
 0x2ff   :  { %2120 = vmatmul.mubr.msk.bf16.vlgmr.msra.gmra.mxu0 %vm19_vm1, %v1282_v3  ;;  %2136 = vmatpush3.bf16.msra.mxu1 %v1704_v59  ;;  %v1131_v36 = vmul.f32 %v2172_v50, %v1130_v2  ;;  %v1269_v2 = vld [vmem:[#allocation4 + $0x38] sm:$0xff] }
 0x300   :  { %2130 = vmatpush3.bf16.msra.mxu0 %v1658_v5  ;;  %2131 = vmatprep.mubr.msk.bf16.mxu0 %vm2178_vm0, %v2177_v34 }
 0x301   :  { %2137 = vmatprep.mubr.msk.bf16.mxu1 %vm2178_vm0, %v2177_v34  ;;  %v1237_v34 = vrot.slane %v2172_v50, %v2438_v55  ;;  %v1265_v50 = vld [vmem:[#allocation4 + $0x18] sm:$0xff] }
 0x306   :  { %2138 = vmatmul.mubr.msk.bf16.vlgmr.msra.gmra.mxu1 %vm19_vm1, %v1285_v61 }
 0x307   :  { %2132 = vmatmul.mubr.msk.bf16.vlgmr.msra.gmra.mxu0 %vm19_vm1, %v1284_v6 }
 0x30e   :  { %1218 = vbcast.lane.b32.xlu1 %v1216_v52, 256  ;;  %v1264_v52 = vld [vmem:[#allocation4 + $0x10] sm:$0xff] }
 0x312   :  { %1225 = vbcast.lane.b32.xlu1 %v1223_v53, 256 }
 0x314   :  { %1211 = vbcast.lane.b32.xlu0 %v1209_v8, 256 }
 0x316   :  { %1232 = vbcast.lane.b32.xlu1 %v1230_v49, 256 }
 0x318   :  { %1239 = vbcast.lane.b32.xlu0 %v1237_v34, 256 }
 0x31a   :  { %1246 = vbcast.lane.b32.xlu1 %v1244_v9, 256 }
 0x31c   :  { %1253 = vbcast.lane.b32.xlu0 %v1251_v10, 256 }
 0x31e   :  { %1260 = vbcast.lane.b32.xlu1 %v1258_v11, 256 }
 0x376   :  { %v1137_v18 = vpop.xlane.xlu1 %1136 }
 0x377   :  { %v1134_v13 = vpop.xlane.xlu0 %1133  ;;  %v1171_v19 = vrot.slane %v1137_v18, %v2397_v17  ;;  %v1267_v18 = vld [vmem:[#allocation4 + $0x28] sm:$0xff] }
 0x378   :  { %v1167_v38 = vrot.slane %v1134_v13, %v2397_v17 }
 0x37a   :  { %v1196_v45 = vsel %vm1031_vm3, %v1171_v19, %v1167_v38 }
 0x37b   :  { %v1140_v14 = vpop.xlane.xlu0 %1139 }
 0x37c   :  { %v1175_v20 = vrot.slane %v1140_v14, %v2397_v17 }
 0x37e   :  { %v1197_v56 = vsel %vm1033_vm4, %v1175_v20, %v1196_v45 }
 0x37f   :  { %v1143_v35 = vpop.xlane.xlu0 %1142 }
 0x380   :  { %v1179_v22 = vrot.slane %v1143_v35, %v2397_v17  ;;  %v1266_v35 = vld [vmem:[#allocation4 + $0x20] sm:$0xff] }
 0x382   :  { %v1149_v23 = vpop.xlane.xlu1 %1148  ;;  %v1198_v26 = vsel %vm1035_vm5, %v1179_v22, %v1197_v56 }
 0x383   :  { %v1146_v24 = vpop.xlane.xlu0 %1145  ;;  %v1187_v12 = vrot.slane %v1149_v23, %v2397_v17 }
 0x384   :  { %v1183_v25 = vrot.slane %v1146_v24, %v2397_v17 }
 0x386   :  { %v1199_v47 = vsel %vm1037_vm6, %v1183_v25, %v1198_v26  ;;  %v1155_v27 = vpop.xlane.xlu1 %1154 }
 0x387   :  { %v1195_v29 = vrot.slane %v1155_v27, %v2397_v17  ;;  %v1152_v58 = vpop.xlane.xlu0 %1151  ;;  %v1200_v4 = vsel %vm1039_vm7, %v1187_v12, %v1199_v47 }
 0x388   :  { %v1191_v33 = vrot.slane %v1152_v58, %v2397_v17 }
 0x38a   :  { %v1201_v31 = vsel %vm1041_vm8, %v1191_v33, %v1200_v4  ;;  %v1219_v62 = vpop.permute.xlu1 %1218  ;;  %v1268_v4 = vld [vmem:[#allocation4 + $0x30] sm:$0xff] }
 0x38b   :  { %v1202_v32 = vsel %vm1043_vm9, %v1195_v29, %v1201_v31  ;;  %v1212_v39 = vpop.permute.xlu0 %1211 }
 0x38c   :  { %v1204_v37 = vadd.f32 %v1202_v32, %v1131_v36  ;;  %v1270_v59 = vmul.f32 %v1262_v16, %v1212_v39 }
 0x38e   :  { %1205 = vst.msk [vmem:[#allocation3] sm:$0xff] %vm19_vm1, %v1204_v37  ;;  %v1226_v46 = vpop.permute.xlu1 %1225 }
 0x38f   :  { %v1272_v9 = vmul.f32 %v1264_v52, %v1226_v46  ;;  %v1240_v20 = vpop.permute.xlu0 %1239 }
 0x390   :  { %v1274_v56 = vmul.f32 %v1266_v35, %v1240_v20 }
 0x393   :  { %v1254_v36 = vpop.permute.xlu0 %1253 }
 0x395   :  { %v1766_v41 = vld [vmem:[#allocation3] sm:$0xff] }
 0x396   :  { %2173 = vrcp.f32 %v1766_v41 }
 0x3a3   :  { %v2174_v44 = vpop.eup %2173 }
 0x3a4   :  { %v1786_v57 = vrot.slane %v2174_v44, %v2414_v42  ;;  %v1779_v60 = vrot.slane %v2174_v44, %v2417_v43  ;;  %v1800_v17 = vrot.slane %v2174_v44, %v2455_v1  ;;  %v1793_v63 = vrot.slane %v2174_v44, %v2435_v54 }
 0x3a5   :  { %v1814_v40 = vrot.slane %v2174_v44, %v2472_v15  ;;  %v1807_v51 = vrot.slane %v2174_v44, %v2438_v55  ;;  %v1271_v42 = vmul.f32 %v1263_v48, %v1219_v62  ;;  %v1828_v54 = vrot.slane %v2174_v44, %v2486_v28  ;;  %v1233_v15 = vpop.permute.xlu1 %1232 }
 0x3a6   :  { %1788 = vbcast.lane.b32.xlu1 %v1786_v57, 256  ;;  %1781 = vbcast.lane.b32.xlu0 %v1779_v60, 256  ;;  %v1821_v61 = vrot.slane %v2174_v44, %v2463_v7  ;;  %v1273_v49 = vmul.f32 %v1265_v50, %v1233_v15  ;;  %v1276_v44 = vmul.f32 %v1268_v4, %v1254_v36 }
 0x3a9   :  { %v1247_v19 = vpop.permute.xlu1 %1246 }
 0x3aa   :  { %1802 = vbcast.lane.b32.xlu1 %v1800_v17, 256  ;;  %1795 = vbcast.lane.b32.xlu0 %v1793_v63, 256  ;;  %v1275_v45 = vmul.f32 %v1267_v18, %v1247_v19 }
 0x3ad   :  { %v1261_v58 = vpop.permute.xlu1 %1260 }
 0x3ae   :  { %1816 = vbcast.lane.b32.xlu1 %v1814_v40, 256  ;;  %1809 = vbcast.lane.b32.xlu0 %v1807_v51, 256  ;;  %v1464_v43 = vpop.f32.mrf.mxu1  ;;  %v1277_v37 = vmul.f32 %v1269_v2, %v1261_v58 }
 0x3af   :  { %v1418_v0 = vpop.f32.mrf.mxu0  ;;  %v1747_v3 = vadd.f32 %v1464_v43, %v1271_v42 }
 0x3b0   :  { %v1746_v1 = vadd.f32 %v1418_v0, %v1270_v59  ;;  %v2103_v5 = vpop.f32.mrf.mxu1 }
 0x3b1   :  { %1755 = vst.msk [vmem:[#allocation4 + $0x8] sm:$0xff] %vm19_vm1, %v1747_v3  ;;  %v2097_v6 = vpop.f32.mrf.mxu0 }
 0x3b2   :  { %1754 = vst.msk [vmem:[#allocation4] sm:$0xff] %vm19_vm1, %v1746_v1  ;;  %1830 = vbcast.lane.b32.xlu1 %v1828_v54, 256  ;;  %1823 = vbcast.lane.b32.xlu0 %v1821_v61, 256  ;;  %v1467_v55 = vpop.f32.mrf.mxu1 }
 0x3b3   :  { %v1421_v53 = vpop.f32.mrf.mxu0 }
 0x3b4   :  { %v2104_v8 = vpop.f32.mrf.mxu1 }
 0x3b5   :  { %v2098_v34 = vpop.f32.mrf.mxu0 }
 0x3b6   :  { %v1556_v10 = vpop.f32.mrf.mxu1 }
 0x3b7   :  { %v1510_v28 = vpop.f32.mrf.mxu0  ;;  %v1749_v11 = vadd.f32 %v1556_v10, %v1273_v49 }
 0x3b8   :  { %v1748_v7 = vadd.f32 %v1510_v28, %v1272_v9  ;;  %v2115_v13 = vpop.f32.mrf.mxu1  ;;  %v1769_v54 = vld [vmem:[#allocation4 + $0x8] sm:$0xff] }
 0x3b9   :  { %1757 = vst.msk [vmem:[#allocation4 + $0x18] sm:$0xff] %vm19_vm1, %v1749_v11  ;;  %v2109_v14 = vpop.f32.mrf.mxu0  ;;  %v1768_v61 = vld [vmem:[#allocation4] sm:$0xff] }
 0x3ba   :  { %1756 = vst.msk [vmem:[#allocation4 + $0x10] sm:$0xff] %vm19_vm1, %v1748_v7  ;;  %v1559_v38 = vpop.f32.mrf.mxu1 }
 0x3bb   :  { %v1513_v22 = vpop.f32.mrf.mxu0 }
 0x3bc   :  { %v2116_v23 = vpop.f32.mrf.mxu1 }
 0x3bd   :  { %v2110_v24 = vpop.f32.mrf.mxu0 }
 0x3be   :  { %v1648_v25 = vpop.f32.mrf.mxu1 }
 0x3bf   :  { %v1602_v26 = vpop.f32.mrf.mxu0  ;;  %v1751_v12 = vadd.f32 %v1648_v25, %v1275_v45 }
 0x3c0   :  { %v1750_v47 = vadd.f32 %v1602_v26, %v1274_v56  ;;  %v2127_v27 = vpop.f32.mrf.mxu1  ;;  %v1771_v59 = vld [vmem:[#allocation4 + $0x18] sm:$0xff] }
 0x3c1   :  { %1759 = vst.msk [vmem:[#allocation4 + $0x28] sm:$0xff] %vm19_vm1, %v1751_v12  ;;  %v2121_v29 = vpop.f32.mrf.mxu0  ;;  %v1770_v3 = vld [vmem:[#allocation4 + $0x10] sm:$0xff] }
 0x3c2   :  { %1758 = vst.msk [vmem:[#allocation4 + $0x20] sm:$0xff] %vm19_vm1, %v1750_v47  ;;  %v1651_v33 = vpop.f32.mrf.mxu1 }
 0x3c3   :  { %v1605_v31 = vpop.f32.mrf.mxu0 }
 0x3c4   :  { %v2128_v32 = vpop.f32.mrf.mxu1 }
 0x3c5   :  { %v2122_v41 = vpop.f32.mrf.mxu0 }
 0x3c6   :  { %v1740_v57 = vpop.f32.mrf.mxu1 }
 0x3c7   :  { %v1694_v60 = vpop.f32.mrf.mxu0  ;;  %v1753_v62 = vadd.f32 %v1740_v57, %v1277_v37 }
 0x3c8   :  { %v1752_v17 = vadd.f32 %v1694_v60, %v1276_v44  ;;  %v2139_v63 = vpop.f32.mrf.mxu1  ;;  %v1773_v34 = vld [vmem:[#allocation4 + $0x28] sm:$0xff] }
 0x3c9   :  { %1761 = vst.msk [vmem:[#allocation4 + $0x38] sm:$0xff] %vm19_vm1, %v1753_v62  ;;  %v2133_v48 = vpop.f32.mrf.mxu0  ;;  %v1772_v7 = vld [vmem:[#allocation4 + $0x20] sm:$0xff] }
 0x3ca   :  { %1760 = vst.msk [vmem:[#allocation4 + $0x30] sm:$0xff] %vm19_vm1, %v1752_v17  ;;  %v1743_v16 = vpop.f32.mrf.mxu1 }
 0x3cb   :  { %v1697_v39 = vpop.f32.mrf.mxu0 }
 0x3cc   :  { %v2140_v46 = vpop.f32.mrf.mxu1 }
 0x3cd   :  { %v2134_v40 = vpop.f32.mrf.mxu0 }
 0x3d0   :  { %v1775_v13 = vld [vmem:[#allocation4 + $0x38] sm:$0xff] }
 0x3d1   :  { %v1774_v14 = vld [vmem:[#allocation4 + $0x30] sm:$0xff] }
 0x418   :  { %v1789_v51 = vpop.permute.xlu1 %1788  ;;  %v1782_v42 = vpop.permute.xlu0 %1781 }
 0x419   :  { %v1833_v6 = vmul.f32 %v1789_v51, %v1769_v54  ;;  %v1832_v50 = vmul.f32 %v1782_v42, %v1768_v61 }
 0x41c   :  { %v1803_v43 = vpop.permute.xlu1 %1802  ;;  %v1796_v0 = vpop.permute.xlu0 %1795 }
 0x41d   :  { %v1835_v1 = vmul.f32 %v1803_v43, %v1771_v59  ;;  %v1834_v5 = vmul.f32 %v1796_v0, %v1770_v3 }
 0x41f   :  { %v1856_v52 = vcombine.low %v1833_v6, %v1835_v1  ;;  %v1840_v53 = vcombine.low %v1832_v50, %v1834_v5  ;;  %v1857_v8 = vcombine.high %v1833_v6, %v1835_v1  ;;  %v1841_v49 = vcombine.high %v1832_v50, %v1834_v5 }
 0x420   :  { %v1817_v15 = vpop.permute.xlu1 %1816  ;;  %v1810_v55 = vpop.permute.xlu0 %1809 }
 0x421   :  { %v1864_v28 = vrot.slane %v1856_v52, %v2229_v21  ;;  %v1848_v11 = vrot.slane %v1840_v53, %v2229_v21  ;;  %v1837_v18 = vmul.f32 %v1817_v15, %v1773_v34  ;;  %v1836_v19 = vmul.f32 %v1810_v55, %v1772_v7 }
 0x422   :  { %v1871_v20 = vrot.slane %v1857_v8, %v2229_v21  ;;  %v1855_v22 = vrot.slane %v1841_v49, %v2229_v21 }
 0x423   :  { %v1904_v25 = vcombine.low %v1848_v11, %v1864_v28  ;;  %v1905_v26 = vcombine.high %v1848_v11, %v1864_v28 }
 0x424   :  { %v1831_v9 = vpop.permute.xlu1 %1830  ;;  %v1824_v10 = vpop.permute.xlu0 %1823  ;;  %v1920_v2 = vcombine.low %v1855_v22, %v1871_v20  ;;  %v1921_v58 = vcombine.high %v1855_v22, %v1871_v20 }
 0x425   :  { %v1839_v38 = vmul.f32 %v1831_v9, %v1775_v13  ;;  %v1838_v35 = vmul.f32 %v1824_v10, %v1774_v14  ;;  %v1912_v32 = vrot.slane %v1904_v25, %v2233_v30  ;;  %v1919_v37 = vrot.slane %v1905_v26, %v2233_v30 }
 0x426   :  { %v1935_v62 = vrot.slane %v1921_v58, %v2233_v30 }
 0x427   :  { %v1888_v23 = vcombine.low %v1837_v18, %v1839_v38  ;;  %v1889_v45 = vcombine.high %v1837_v18, %v1839_v38  ;;  %v1872_v24 = vcombine.low %v1836_v19, %v1838_v35  ;;  %v1873_v56 = vcombine.high %v1836_v19, %v1838_v35 }
 0x429   :  { %v1896_v12 = vrot.slane %v1888_v23, %v2229_v21  ;;  %v1903_v47 = vrot.slane %v1889_v45, %v2229_v21  ;;  %v1880_v27 = vrot.slane %v1872_v24, %v2229_v21  ;;  %v1887_v29 = vrot.slane %v1873_v56, %v2229_v21 }
 0x42a   :  { %v1928_v21 = vrot.slane %v1920_v2, %v2233_v30 }
 0x42b   :  { %v1936_v33 = vcombine.low %v1880_v27, %v1896_v12  ;;  %v1937_v4 = vcombine.high %v1880_v27, %v1896_v12  ;;  %v1952_v36 = vcombine.low %v1887_v29, %v1903_v47  ;;  %v1953_v31 = vcombine.high %v1887_v29, %v1903_v47 }
 0x42d   :  { %v1944_v41 = vrot.slane %v1936_v33, %v2233_v30  ;;  %v1951_v44 = vrot.slane %v1937_v4, %v2233_v30  ;;  %v1960_v57 = vrot.slane %v1952_v36, %v2233_v30  ;;  %v1967_v60 = vrot.slane %v1953_v31, %v2233_v30 }
 0x42f   :  { %v1968_v17 = vcombine.low %v1912_v32, %v1944_v41  ;;  %v1969_v63 = vcombine.high %v1912_v32, %v1944_v41  ;;  %v1970_v48 = vcombine.low %v1919_v37, %v1951_v44  ;;  %v1971_v16 = vcombine.high %v1919_v37, %v1951_v44 }
 0x430   :  { %v1972_v39 = vcombine.low %v1928_v21, %v1960_v57  ;;  %v1973_v46 = vcombine.high %v1928_v21, %v1960_v57  ;;  %v1974_v40 = vcombine.low %v1935_v62, %v1967_v60  ;;  %v1975_v51 = vcombine.high %v1935_v62, %v1967_v60 }
 0x431   :  { %v1976_v42 = vpack.c.bf16 %v1968_v17, %v1968_v17  ;;  %v1977_v59 = vpack.c.bf16 %v1969_v63, %v1969_v63  ;;  %v1978_v43 = vpack.c.bf16 %v1970_v48, %v1970_v48  ;;  %v1979_v0 = vpack.c.bf16 %v1971_v16, %v1971_v16 }
 0x432   :  { %v1980_v3 = vpack.c.bf16 %v1972_v39, %v1972_v39  ;;  %v1981_v1 = vpack.c.bf16 %v1973_v46, %v1973_v46  ;;  %v1982_v5 = vpack.c.bf16 %v1974_v40, %v1974_v40  ;;  %v1983_v54 = vpack.c.bf16 %v1975_v51, %v1975_v51 }
 0x433   :  { %1985 = vst.msk [vmem:[%s2669_s3] sm:$0xf] %vm1984_vm10, %v1976_v42  ;;  %1986 = vst.msk [vmem:[%s2669_s3 + $0x4] sm:$0xf] %vm1984_vm10, %v1977_v59 }
 0x434   :  { %1987 = vst.msk [vmem:[%s2669_s3 + $0x8] sm:$0xf] %vm1984_vm10, %v1978_v43  ;;  %1988 = vst.msk [vmem:[%s2669_s3 + $0xc] sm:$0xf] %vm1984_vm10, %v1979_v0 }
 0x435   :  { %1989 = vst.msk [vmem:[%s2669_s3 + $0x10] sm:$0xf] %vm1984_vm10, %v1980_v3  ;;  %1990 = vst.msk [vmem:[%s2669_s3 + $0x14] sm:$0xf] %vm1984_vm10, %v1981_v1 }
 0x436   :  { %1991 = vst.msk [vmem:[%s2669_s3 + $0x18] sm:$0xf] %vm1984_vm10, %v1982_v5  ;;  %1992 = vst.msk [vmem:[%s2669_s3 + $0x1c] sm:$0xf] %vm1984_vm10, %v1983_v54 }

</bundles_post_ra>
